<compile_context>
chip_gen: v6e
topology: v6e:2x2x1
jax: 0.10.0
libtpu: 0.0.40
codegen_flags: <defaults>
</compile_context>

<pallas_src>
import jax
import jax.numpy as jnp
from jax.experimental import pallas as pl
from jax.experimental.pallas import tpu as pltpu


def _round_up(x, m):
    return (x + m - 1) // m * m


def dqn_mlp_kernel(x_ref, w0_ref, wh_ref, b_ref, wo_ref, o_ref):
    """Fused MLP forward for one batch tile.

    x_ref  : (TB, Din)            f32   (raw input, padded/cast in-kernel)
    w0_ref : (Din_pad, H)         bf16  (rows >= Din are zero)
    wh_ref : (n_hidden, H, H)     bf16  (packed hidden-layer weights)
    b_ref  : (n_hidden + 2, H)    f32   (input+hidden biases; last row = output
                                         bias zero-padded to H)
    wo_ref : (H, out)             bf16
    o_ref  : (TB, out)            f32
    """
    n_hidden = wh_ref.shape[0]
    din = x_ref.shape[1]
    din_pad = w0_ref.shape[0]
    out_dim = wo_ref.shape[1]

    b = b_ref[...]                                   # (n_hidden + 2, H), load once

    # In-kernel feature pad (6 -> 8) + bf16 cast: trivial VPU work inside one
    # (8,128) tile, avoids a separate XLA pad/convert pass over x.
    x = x_ref[...]                                   # (TB, din) f32
    if din_pad != din:
        x = jnp.concatenate(
            [x, jnp.zeros((x.shape[0], din_pad - din), x.dtype)], axis=-1)
    x = x.astype(jnp.bfloat16)

    # input layer + ReLU
    h = jnp.dot(x, w0_ref[...], preferred_element_type=jnp.float32)
    h = jnp.maximum(h + b[0:1, :], 0.0)

    # hidden layers + ReLU (unrolled; weights come from one packed slab)
    for l in range(n_hidden):
        h = jnp.dot(h.astype(jnp.bfloat16), wh_ref[l],
                    preferred_element_type=jnp.float32)
        h = jnp.maximum(h + b[l + 1:l + 2, :], 0.0)

    # output layer (no activation); output bias is the last b_all row
    out = jnp.dot(h.astype(jnp.bfloat16), wo_ref[...],
                  preferred_element_type=jnp.float32)
    o_ref[...] = (out + b[n_hidden + 1:n_hidden + 2, :out_dim]).astype(o_ref.dtype)


def dqn_forward(x, packed, *, max_batch_tile=1024):
    """x: (B, input_dim) f32. packed: (w0, wh, b_all, wo) from pack_params."""
    w0, wh, b_all, wo = packed
    B, D = x.shape
    out_dim = wo.shape[1]

    # One big tile for small/medium batches (single grid step); multiple-of-256
    # tiles for large batches to amortize per-step pipeline overhead.
    tb = min(max_batch_tile, _round_up(B, 8))
    b_pad = _round_up(B, tb)
    if b_pad != B:
        x = jnp.pad(x, ((0, b_pad - B), (0, 0)))
    grid = (b_pad // tb,)

    # v7x has per-core VMEM: splitting the batch axis across both TensorCores
    # duplicates the ~0.66 MiB weight stream.  Only mark it parallel when the
    # batch is big enough to amortize that; otherwise keep it "arbitrary".
    semantics = ("parallel",) if b_pad >= 2048 else ("arbitrary",)

    def run(weight_mode):
        def wspec(shape, imap):
            return pl.BlockSpec(shape, imap, pipeline_mode=weight_mode)
        return pl.pallas_call(
            dqn_mlp_kernel,
            grid=grid,
            in_specs=[
                pl.BlockSpec((tb, D), lambda i: (i, 0)),
                # constant block indices -> weights stay resident across tiles
                wspec(w0.shape, lambda i: (0, 0)),
                wspec(wh.shape, lambda i: (0, 0, 0)),
                wspec(b_all.shape, lambda i: (0, 0)),
                wspec(wo.shape, lambda i: (0, 0)),
            ],
            out_specs=pl.BlockSpec((tb, out_dim), lambda i: (i, 0)),
            out_shape=jax.ShapeDtypeStruct((b_pad, out_dim), jnp.float32),
            compiler_params=pltpu.CompilerParams(
                dimension_semantics=semantics),
        )(x, w0, wh, b_all, wo)

    try:
        # Constant-index operands don't need double-buffering; single-buffer
        # them to drop the extra ~0.66 MiB VMEM + revolving-buffer bookkeeping.
        out = run(pl.Buffered(buffer_count=1))
    except Exception:
        # Fallback for jax versions without single-buffer support on the
        # top-level pallas_call pipeline (default double-buffering).
        out = run(None)
    return out[:B]


def pack_params(ws, bs):
    """Pack per-layer f32 (W, b) into the coalesced bf16/f32 slabs the kernel uses.

    ws[i]: (in_i, out_i) already in (in, out) layout; bs[i]: (out_i,).
    """
    in_dim, hidden = ws[0].shape
    out_dim = ws[-1].shape[1]
    din_pad = _round_up(in_dim, 8)
    w0 = jnp.zeros((din_pad, hidden), jnp.float32).at[:in_dim].set(ws[0])
    w0 = w0.astype(jnp.bfloat16)                          # (8, 256)
    wh = jnp.stack(ws[1:-1]).astype(jnp.bfloat16)         # (5, 256, 256)
    wo = ws[-1].astype(jnp.bfloat16)                      # (256, 4)
    # biases of input + hidden layers, then output bias zero-padded to H
    b_out = jnp.zeros((hidden,), jnp.float32).at[:out_dim].set(bs[-1])
    b_all = jnp.stack(list(bs[:-1]) + [b_out]).astype(jnp.float32)  # (7, 256)
    return (w0, wh, b_all, wo)


def init_params(key, input_dim=6, hidden_dim=256, output_dim=4, depth=6):
    """nn.Linear-style U(-1/sqrt(fan_in), 1/sqrt(fan_in)) init, then packed."""
    dims = [input_dim] + [hidden_dim] * depth + [output_dim]
    ws, bs = [], []
    for fan_in, fan_out in zip(dims[:-1], dims[1:]):
        key, kw, kb = jax.random.split(key, 3)
        bound = 1.0 / (fan_in ** 0.5)
        ws.append(jax.random.uniform(kw, (fan_in, fan_out), jnp.float32, -bound, bound))
        bs.append(jax.random.uniform(kb, (fan_out,), jnp.float32, -bound, bound))
    return pack_params(ws, bs)


def reference_forward(x, packed):
    """Pure-JAX reference with the same bf16 quantization the kernel applies.

    NOTE: weights/activations are intentionally quantized to bf16 (documented
    deviation from the f32 PyTorch model); MXU accumulation stays f32.
    """
    w0, wh, b_all, wo = packed
    f32 = jnp.float32

    def q(v):  # round activations/inputs to bf16 like the kernel does
        return v.astype(jnp.bfloat16).astype(f32)

    din_pad = w0.shape[0]
    n_hidden = wh.shape[0]
    out_dim = wo.shape[1]
    xp = jnp.pad(x, ((0, 0), (0, din_pad - x.shape[1])))
    h = jnp.maximum(q(xp) @ w0.astype(f32) + b_all[0:1, :], 0.0)
    for l in range(n_hidden):
        h = jnp.maximum(q(h) @ wh[l].astype(f32) + b_all[l + 1:l + 2, :], 0.0)
    return q(h) @ wo.astype(f32) + b_all[n_hidden + 1:n_hidden + 2, :out_dim]


if __name__ == "__main__":
    key = jax.random.PRNGKey(0)
    key, kx = jax.random.split(key)

    batch, input_dim, hidden_dim, output_dim, depth = 8, 6, 256, 4, 6
    x = jax.random.normal(kx, (batch, input_dim), jnp.float32)
    packed = init_params(key, input_dim, hidden_dim, output_dim, depth)

    out = dqn_forward(x, packed)
    out = jax.block_until_ready(out)

    ref = reference_forward(x, packed)
    assert out.shape == (batch, output_dim)
    assert jnp.allclose(out, ref, atol=1e-3, rtol=1e-3), "mismatch vs. JAX reference"

    print("KERNEL_OK")
</pallas_src>

<mosaic_0001>
module attributes {stable_mosaic.version = 11 : i64} {
  func.func @dqn_mlp_kernel(%arg0: i32, %arg1: memref<8x6xf32, #tpu.memory_space<vmem>>, %arg2: memref<8x256xbf16, #tpu.memory_space<vmem>>, %arg3: memref<5x256x256xbf16, #tpu.memory_space<vmem>>, %arg4: memref<7x256xf32, #tpu.memory_space<vmem>>, %arg5: memref<256x4xbf16, #tpu.memory_space<vmem>>, %arg6: memref<8x4xf32, #tpu.memory_space<vmem>>) attributes {dimension_semantics = [#tpu.dimension_semantics<arbitrary>], iteration_bounds = array<i64: 1>, scalar_prefetch = 0 : i64, scratch_operands = 0 : i64, tpu.core_type = #tpu.core_type<tc>, window_params = [{transform_indices = @transform_0, window_bounds = array<i64: 8, 6>}, {pipeline_mode = #tpu.pipeline_mode<synchronous>, transform_indices = @transform_1, window_bounds = array<i64: 8, 256>}, {pipeline_mode = #tpu.pipeline_mode<synchronous>, transform_indices = @transform_2, window_bounds = array<i64: 5, 256, 256>}, {pipeline_mode = #tpu.pipeline_mode<synchronous>, transform_indices = @transform_3, window_bounds = array<i64: 7, 256>}, {pipeline_mode = #tpu.pipeline_mode<synchronous>, transform_indices = @transform_4, window_bounds = array<i64: 256, 4>}, {transform_indices = @transform_5, window_bounds = array<i64: 8, 4>}]} {
    %c0 = arith.constant 0 : index
    %c0_0 = arith.constant 0 : index
    %0 = vector.load %arg4[%c0, %c0_0] : memref<7x256xf32, #tpu.memory_space<vmem>>, vector<7x256xf32>
    %c0_1 = arith.constant 0 : index
    %c0_2 = arith.constant 0 : index
    %1 = vector.load %arg1[%c0_1, %c0_2] : memref<8x6xf32, #tpu.memory_space<vmem>>, vector<8x6xf32>
    %cst = arith.constant 0.000000e+00 : f32
    %2 = vector.broadcast %cst : f32 to vector<8x2xf32>
    %3 = tpu.concatenate %1, %2 in 1 : vector<8x6xf32>, vector<8x2xf32> -> vector<8x8xf32>
    %4 = arith.truncf %3 : vector<8x8xf32> to vector<8x8xbf16>
    %c0_3 = arith.constant 0 : index
    %c0_4 = arith.constant 0 : index
    %5 = vector.load %arg2[%c0_3, %c0_4] : memref<8x256xbf16, #tpu.memory_space<vmem>>, vector<8x256xbf16>
    %cst_5 = arith.constant dense<0.000000e+00> : vector<8x256xf32>
    %6 = tpu.matmul %4, %5, %cst_5 {dimension_numbers = #tpu.dot_dimension_numbers<[1], [0], [0], [1], [0, 0, 1, 1], [], []>} : vector<8x8xbf16>, vector<8x256xbf16>, vector<8x256xf32> -> vector<8x256xf32>
    %7 = vector.extract_strided_slice %0 {offsets = [0, 0], sizes = [1, 256], strides = [1, 1]} : vector<7x256xf32> to vector<1x256xf32>
    %8 = vector.broadcast %7 : vector<1x256xf32> to vector<8x256xf32>
    %9 = arith.addf %6, %8 : vector<8x256xf32>
    %cst_6 = arith.constant 0.000000e+00 : f32
    %10 = vector.broadcast %cst_6 : f32 to vector<8x256xf32>
    %11 = arith.maximumf %9, %10 : vector<8x256xf32>
    %12 = arith.truncf %11 : vector<8x256xf32> to vector<8x256xbf16>
    %c0_7 = arith.constant 0 : index
    %c0_8 = arith.constant 0 : index
    %c0_9 = arith.constant 0 : index
    %13 = vector.load %arg3[%c0_7, %c0_8, %c0_9] : memref<5x256x256xbf16, #tpu.memory_space<vmem>>, vector<1x256x256xbf16>
    %14 = vector.shape_cast %13 : vector<1x256x256xbf16> to vector<256x256xbf16>
    %cst_10 = arith.constant dense<0.000000e+00> : vector<8x256xf32>
    %15 = tpu.matmul %12, %14, %cst_10 {dimension_numbers = #tpu.dot_dimension_numbers<[1], [0], [0], [1], [0, 0, 1, 1], [], []>} : vector<8x256xbf16>, vector<256x256xbf16>, vector<8x256xf32> -> vector<8x256xf32>
    %16 = vector.extract_strided_slice %0 {offsets = [1, 0], sizes = [1, 256], strides = [1, 1]} : vector<7x256xf32> to vector<1x256xf32>
    %17 = vector.broadcast %16 : vector<1x256xf32> to vector<8x256xf32>
    %18 = arith.addf %15, %17 : vector<8x256xf32>
    %cst_11 = arith.constant 0.000000e+00 : f32
    %19 = vector.broadcast %cst_11 : f32 to vector<8x256xf32>
    %20 = arith.maximumf %18, %19 : vector<8x256xf32>
    %21 = arith.truncf %20 : vector<8x256xf32> to vector<8x256xbf16>
    %c1 = arith.constant 1 : index
    %c0_12 = arith.constant 0 : index
    %c0_13 = arith.constant 0 : index
    %22 = vector.load %arg3[%c1, %c0_12, %c0_13] : memref<5x256x256xbf16, #tpu.memory_space<vmem>>, vector<1x256x256xbf16>
    %23 = vector.shape_cast %22 : vector<1x256x256xbf16> to vector<256x256xbf16>
    %cst_14 = arith.constant dense<0.000000e+00> : vector<8x256xf32>
    %24 = tpu.matmul %21, %23, %cst_14 {dimension_numbers = #tpu.dot_dimension_numbers<[1], [0], [0], [1], [0, 0, 1, 1], [], []>} : vector<8x256xbf16>, vector<256x256xbf16>, vector<8x256xf32> -> vector<8x256xf32>
    %25 = vector.extract_strided_slice %0 {offsets = [2, 0], sizes = [1, 256], strides = [1, 1]} : vector<7x256xf32> to vector<1x256xf32>
    %26 = vector.broadcast %25 : vector<1x256xf32> to vector<8x256xf32>
    %27 = arith.addf %24, %26 : vector<8x256xf32>
    %cst_15 = arith.constant 0.000000e+00 : f32
    %28 = vector.broadcast %cst_15 : f32 to vector<8x256xf32>
    %29 = arith.maximumf %27, %28 : vector<8x256xf32>
    %30 = arith.truncf %29 : vector<8x256xf32> to vector<8x256xbf16>
    %c2 = arith.constant 2 : index
    %c0_16 = arith.constant 0 : index
    %c0_17 = arith.constant 0 : index
    %31 = vector.load %arg3[%c2, %c0_16, %c0_17] : memref<5x256x256xbf16, #tpu.memory_space<vmem>>, vector<1x256x256xbf16>
    %32 = vector.shape_cast %31 : vector<1x256x256xbf16> to vector<256x256xbf16>
    %cst_18 = arith.constant dense<0.000000e+00> : vector<8x256xf32>
    %33 = tpu.matmul %30, %32, %cst_18 {dimension_numbers = #tpu.dot_dimension_numbers<[1], [0], [0], [1], [0, 0, 1, 1], [], []>} : vector<8x256xbf16>, vector<256x256xbf16>, vector<8x256xf32> -> vector<8x256xf32>
    %34 = vector.extract_strided_slice %0 {offsets = [3, 0], sizes = [1, 256], strides = [1, 1]} : vector<7x256xf32> to vector<1x256xf32>
    %35 = vector.broadcast %34 : vector<1x256xf32> to vector<8x256xf32>
    %36 = arith.addf %33, %35 : vector<8x256xf32>
    %cst_19 = arith.constant 0.000000e+00 : f32
    %37 = vector.broadcast %cst_19 : f32 to vector<8x256xf32>
    %38 = arith.maximumf %36, %37 : vector<8x256xf32>
    %39 = arith.truncf %38 : vector<8x256xf32> to vector<8x256xbf16>
    %c3 = arith.constant 3 : index
    %c0_20 = arith.constant 0 : index
    %c0_21 = arith.constant 0 : index
    %40 = vector.load %arg3[%c3, %c0_20, %c0_21] : memref<5x256x256xbf16, #tpu.memory_space<vmem>>, vector<1x256x256xbf16>
    %41 = vector.shape_cast %40 : vector<1x256x256xbf16> to vector<256x256xbf16>
    %cst_22 = arith.constant dense<0.000000e+00> : vector<8x256xf32>
    %42 = tpu.matmul %39, %41, %cst_22 {dimension_numbers = #tpu.dot_dimension_numbers<[1], [0], [0], [1], [0, 0, 1, 1], [], []>} : vector<8x256xbf16>, vector<256x256xbf16>, vector<8x256xf32> -> vector<8x256xf32>
    %43 = vector.extract_strided_slice %0 {offsets = [4, 0], sizes = [1, 256], strides = [1, 1]} : vector<7x256xf32> to vector<1x256xf32>
    %44 = vector.broadcast %43 : vector<1x256xf32> to vector<8x256xf32>
    %45 = arith.addf %42, %44 : vector<8x256xf32>
    %cst_23 = arith.constant 0.000000e+00 : f32
    %46 = vector.broadcast %cst_23 : f32 to vector<8x256xf32>
    %47 = arith.maximumf %45, %46 : vector<8x256xf32>
    %48 = arith.truncf %47 : vector<8x256xf32> to vector<8x256xbf16>
    %c4 = arith.constant 4 : index
    %c0_24 = arith.constant 0 : index
    %c0_25 = arith.constant 0 : index
    %49 = vector.load %arg3[%c4, %c0_24, %c0_25] : memref<5x256x256xbf16, #tpu.memory_space<vmem>>, vector<1x256x256xbf16>
    %50 = vector.shape_cast %49 : vector<1x256x256xbf16> to vector<256x256xbf16>
    %cst_26 = arith.constant dense<0.000000e+00> : vector<8x256xf32>
    %51 = tpu.matmul %48, %50, %cst_26 {dimension_numbers = #tpu.dot_dimension_numbers<[1], [0], [0], [1], [0, 0, 1, 1], [], []>} : vector<8x256xbf16>, vector<256x256xbf16>, vector<8x256xf32> -> vector<8x256xf32>
    %52 = vector.extract_strided_slice %0 {offsets = [5, 0], sizes = [1, 256], strides = [1, 1]} : vector<7x256xf32> to vector<1x256xf32>
    %53 = vector.broadcast %52 : vector<1x256xf32> to vector<8x256xf32>
    %54 = arith.addf %51, %53 : vector<8x256xf32>
    %cst_27 = arith.constant 0.000000e+00 : f32
    %55 = vector.broadcast %cst_27 : f32 to vector<8x256xf32>
    %56 = arith.maximumf %54, %55 : vector<8x256xf32>
    %57 = arith.truncf %56 : vector<8x256xf32> to vector<8x256xbf16>
    %c0_28 = arith.constant 0 : index
    %c0_29 = arith.constant 0 : index
    %58 = vector.load %arg5[%c0_28, %c0_29] : memref<256x4xbf16, #tpu.memory_space<vmem>>, vector<256x4xbf16>
    %cst_30 = arith.constant dense<0.000000e+00> : vector<8x4xf32>
    %59 = tpu.matmul %57, %58, %cst_30 {dimension_numbers = #tpu.dot_dimension_numbers<[1], [0], [0], [1], [0, 0, 1, 1], [], []>} : vector<8x256xbf16>, vector<256x4xbf16>, vector<8x4xf32> -> vector<8x4xf32>
    %60 = vector.extract_strided_slice %0 {offsets = [6, 0], sizes = [1, 4], strides = [1, 1]} : vector<7x256xf32> to vector<1x4xf32>
    %61 = vector.broadcast %60 : vector<1x4xf32> to vector<8x4xf32>
    %62 = arith.addf %59, %61 : vector<8x4xf32>
    %c0_31 = arith.constant 0 : index
    %c0_32 = arith.constant 0 : index
    %63 = vector.load %arg6[%c0_31, %c0_32] : memref<8x4xf32, #tpu.memory_space<vmem>>, vector<8x4xf32>
    tpu.vector_store %arg6[%c0_31, %c0_32], %62 {strides = array<i32>} : memref<8x4xf32, #tpu.memory_space<vmem>>, vector<8x4xf32>,
    return
  }
  func.func @transform_0(%arg0: i32) -> (i32, i32) {
    %c0_i32 = arith.constant 0 : i32
    %c0_i32_0 = arith.constant 0 : i32
    return %arg0, %c0_i32 : i32, i32
  }
  func.func @transform_1(%arg0: i32) -> (i32, i32) {
    %c0_i32 = arith.constant 0 : i32
    %c0_i32_0 = arith.constant 0 : i32
    %c0_i32_1 = arith.constant 0 : i32
    return %c0_i32, %c0_i32_0 : i32, i32
  }
  func.func @transform_2(%arg0: i32) -> (i32, i32, i32) {
    %c0_i32 = arith.constant 0 : i32
    %c0_i32_0 = arith.constant 0 : i32
    %c0_i32_1 = arith.constant 0 : i32
    %c0_i32_2 = arith.constant 0 : i32
    return %c0_i32, %c0_i32_0, %c0_i32_1 : i32, i32, i32
  }
  func.func @transform_3(%arg0: i32) -> (i32, i32) {
    %c0_i32 = arith.constant 0 : i32
    %c0_i32_0 = arith.constant 0 : i32
    %c0_i32_1 = arith.constant 0 : i32
    return %c0_i32, %c0_i32_0 : i32, i32
  }
  func.func @transform_4(%arg0: i32) -> (i32, i32) {
    %c0_i32 = arith.constant 0 : i32
    %c0_i32_0 = arith.constant 0 : i32
    %c0_i32_1 = arith.constant 0 : i32
    return %c0_i32, %c0_i32_0 : i32, i32
  }
  func.func @transform_5(%arg0: i32) -> (i32, i32) {
    %c0_i32 = arith.constant 0 : i32
    %c0_i32_0 = arith.constant 0 : i32
    return %arg0, %c0_i32 : i32, i32
  }
}

module attributes {stable_mosaic.version = 11 : i64} {
  func.func @dqn_mlp_kernel(%arg0: i32, %arg1: memref<8x6xf32, #tpu.memory_space<vmem>>, %arg2: memref<8x256xbf16, #tpu.memory_space<vmem>>, %arg3: memref<5x256x256xbf16, #tpu.memory_space<vmem>>, %arg4: memref<7x256xf32, #tpu.memory_space<vmem>>, %arg5: memref<256x4xbf16, #tpu.memory_space<vmem>>, %arg6: memref<8x4xf32, #tpu.memory_space<vmem>>) attributes {dimension_semantics = [#tpu.dimension_semantics<arbitrary>], iteration_bounds = array<i64: 1>, scalar_prefetch = 0 : i64, scratch_operands = 0 : i64, tpu.core_type = #tpu.core_type<tc>, window_params = [{transform_indices = @transform_0, window_bounds = array<i64: 8, 6>}, {pipeline_mode = #tpu.pipeline_mode<synchronous>, transform_indices = @transform_1, window_bounds = array<i64: 8, 256>}, {pipeline_mode = #tpu.pipeline_mode<synchronous>, transform_indices = @transform_2, window_bounds = array<i64: 5, 256, 256>}, {pipeline_mode = #tpu.pipeline_mode<synchronous>, transform_indices = @transform_3, window_bounds = array<i64: 7, 256>}, {pipeline_mode = #tpu.pipeline_mode<synchronous>, transform_indices = @transform_4, window_bounds = array<i64: 256, 4>}, {transform_indices = @transform_5, window_bounds = array<i64: 8, 4>}]} {
    %c0 = arith.constant 0 : index
    %c0_0 = arith.constant 0 : index
    %0 = vector.load %arg4[%c0, %c0_0] : memref<7x256xf32, #tpu.memory_space<vmem>>, vector<7x256xf32>
    %c0_1 = arith.constant 0 : index
    %c0_2 = arith.constant 0 : index
    %1 = vector.load %arg1[%c0_1, %c0_2] : memref<8x6xf32, #tpu.memory_space<vmem>>, vector<8x6xf32>
    %cst = arith.constant 0.000000e+00 : f32
    %2 = vector.broadcast %cst : f32 to vector<8x2xf32>
    %3 = tpu.concatenate %1, %2 in 1 : vector<8x6xf32>, vector<8x2xf32> -> vector<8x8xf32>
    %4 = arith.truncf %3 : vector<8x8xf32> to vector<8x8xbf16>
    %c0_3 = arith.constant 0 : index
    %c0_4 = arith.constant 0 : index
    %5 = vector.load %arg2[%c0_3, %c0_4] : memref<8x256xbf16, #tpu.memory_space<vmem>>, vector<8x256xbf16>
    %cst_5 = arith.constant dense<0.000000e+00> : vector<8x256xf32>
    %6 = tpu.matmul %4, %5, %cst_5 {dimension_numbers = #tpu.dot_dimension_numbers<[1], [0], [0], [1], [0, 0, 1, 1], [], []>} : vector<8x8xbf16>, vector<8x256xbf16>, vector<8x256xf32> -> vector<8x256xf32>
    %7 = vector.extract_strided_slice %0 {offsets = [0, 0], sizes = [1, 256], strides = [1, 1]} : vector<7x256xf32> to vector<1x256xf32>
    %8 = vector.broadcast %7 : vector<1x256xf32> to vector<8x256xf32>
    %9 = arith.addf %6, %8 : vector<8x256xf32>
    %cst_6 = arith.constant 0.000000e+00 : f32
    %10 = vector.broadcast %cst_6 : f32 to vector<8x256xf32>
    %11 = arith.maximumf %9, %10 : vector<8x256xf32>
    %12 = arith.truncf %11 : vector<8x256xf32> to vector<8x256xbf16>
    %c0_7 = arith.constant 0 : index
    %c0_8 = arith.constant 0 : index
    %c0_9 = arith.constant 0 : index
    %13 = vector.load %arg3[%c0_7, %c0_8, %c0_9] : memref<5x256x256xbf16, #tpu.memory_space<vmem>>, vector<1x256x256xbf16>
    %14 = vector.shape_cast %13 : vector<1x256x256xbf16> to vector<256x256xbf16>
    %cst_10 = arith.constant dense<0.000000e+00> : vector<8x256xf32>
    %15 = tpu.matmul %12, %14, %cst_10 {dimension_numbers = #tpu.dot_dimension_numbers<[1], [0], [0], [1], [0, 0, 1, 1], [], []>} : vector<8x256xbf16>, vector<256x256xbf16>, vector<8x256xf32> -> vector<8x256xf32>
    %16 = vector.extract_strided_slice %0 {offsets = [1, 0], sizes = [1, 256], strides = [1, 1]} : vector<7x256xf32> to vector<1x256xf32>
    %17 = vector.broadcast %16 : vector<1x256xf32> to vector<8x256xf32>
    %18 = arith.addf %15, %17 : vector<8x256xf32>
    %cst_11 = arith.constant 0.000000e+00 : f32
    %19 = vector.broadcast %cst_11 : f32 to vector<8x256xf32>
    %20 = arith.maximumf %18, %19 : vector<8x256xf32>
    %21 = arith.truncf %20 : vector<8x256xf32> to vector<8x256xbf16>
    %c1 = arith.constant 1 : index
    %c0_12 = arith.constant 0 : index
    %c0_13 = arith.constant 0 : index
    %22 = vector.load %arg3[%c1, %c0_12, %c0_13] : memref<5x256x256xbf16, #tpu.memory_space<vmem>>, vector<1x256x256xbf16>
    %23 = vector.shape_cast %22 : vector<1x256x256xbf16> to vector<256x256xbf16>
    %cst_14 = arith.constant dense<0.000000e+00> : vector<8x256xf32>
    %24 = tpu.matmul %21, %23, %cst_14 {dimension_numbers = #tpu.dot_dimension_numbers<[1], [0], [0], [1], [0, 0, 1, 1], [], []>} : vector<8x256xbf16>, vector<256x256xbf16>, vector<8x256xf32> -> vector<8x256xf32>
    %25 = vector.extract_strided_slice %0 {offsets = [2, 0], sizes = [1, 256], strides = [1, 1]} : vector<7x256xf32> to vector<1x256xf32>
    %26 = vector.broadcast %25 : vector<1x256xf32> to vector<8x256xf32>
    %27 = arith.addf %24, %26 : vector<8x256xf32>
    %cst_15 = arith.constant 0.000000e+00 : f32
    %28 = vector.broadcast %cst_15 : f32 to vector<8x256xf32>
    %29 = arith.maximumf %27, %28 : vector<8x256xf32>
    %30 = arith.truncf %29 : vector<8x256xf32> to vector<8x256xbf16>
    %c2 = arith.constant 2 : index
    %c0_16 = arith.constant 0 : index
    %c0_17 = arith.constant 0 : index
    %31 = vector.load %arg3[%c2, %c0_16, %c0_17] : memref<5x256x256xbf16, #tpu.memory_space<vmem>>, vector<1x256x256xbf16>
    %32 = vector.shape_cast %31 : vector<1x256x256xbf16> to vector<256x256xbf16>
    %cst_18 = arith.constant dense<0.000000e+00> : vector<8x256xf32>
    %33 = tpu.matmul %30, %32, %cst_18 {dimension_numbers = #tpu.dot_dimension_numbers<[1], [0], [0], [1], [0, 0, 1, 1], [], []>} : vector<8x256xbf16>, vector<256x256xbf16>, vector<8x256xf32> -> vector<8x256xf32>
    %34 = vector.extract_strided_slice %0 {offsets = [3, 0], sizes = [1, 256], strides = [1, 1]} : vector<7x256xf32> to vector<1x256xf32>
    %35 = vector.broadcast %34 : vector<1x256xf32> to vector<8x256xf32>
    %36 = arith.addf %33, %35 : vector<8x256xf32>
    %cst_19 = arith.constant 0.000000e+00 : f32
    %37 = vector.broadcast %cst_19 : f32 to vector<8x256xf32>
    %38 = arith.maximumf %36, %37 : vector<8x256xf32>
    %39 = arith.truncf %38 : vector<8x256xf32> to vector<8x256xbf16>
    %c3 = arith.constant 3 : index
    %c0_20 = arith.constant 0 : index
    %c0_21 = arith.constant 0 : index
    %40 = vector.load %arg3[%c3, %c0_20, %c0_21] : memref<5x256x256xbf16, #tpu.memory_space<vmem>>, vector<1x256x256xbf16>
    %41 = vector.shape_cast %40 : vector<1x256x256xbf16> to vector<256x256xbf16>
    %cst_22 = arith.constant dense<0.000000e+00> : vector<8x256xf32>
    %42 = tpu.matmul %39, %41, %cst_22 {dimension_numbers = #tpu.dot_dimension_numbers<[1], [0], [0], [1], [0, 0, 1, 1], [], []>} : vector<8x256xbf16>, vector<256x256xbf16>, vector<8x256xf32> -> vector<8x256xf32>
    %43 = vector.extract_strided_slice %0 {offsets = [4, 0], sizes = [1, 256], strides = [1, 1]} : vector<7x256xf32> to vector<1x256xf32>
    %44 = vector.broadcast %43 : vector<1x256xf32> to vector<8x256xf32>
    %45 = arith.addf %42, %44 : vector<8x256xf32>
    %cst_23 = arith.constant 0.000000e+00 : f32
    %46 = vector.broadcast %cst_23 : f32 to vector<8x256xf32>
    %47 = arith.maximumf %45, %46 : vector<8x256xf32>
    %48 = arith.truncf %47 : vector<8x256xf32> to vector<8x256xbf16>
    %c4 = arith.constant 4 : index
    %c0_24 = arith.constant 0 : index
    %c0_25 = arith.constant 0 : index
    %49 = vector.load %arg3[%c4, %c0_24, %c0_25] : memref<5x256x256xbf16, #tpu.memory_space<vmem>>, vector<1x256x256xbf16>
    %50 = vector.shape_cast %49 : vector<1x256x256xbf16> to vector<256x256xbf16>
    %cst_26 = arith.constant dense<0.000000e+00> : vector<8x256xf32>
    %51 = tpu.matmul %48, %50, %cst_26 {dimension_numbers = #tpu.dot_dimension_numbers<[1], [0], [0], [1], [0, 0, 1, 1], [], []>} : vector<8x256xbf16>, vector<256x256xbf16>, vector<8x256xf32> -> vector<8x256xf32>
    %52 = vector.extract_strided_slice %0 {offsets = [5, 0], sizes = [1, 256], strides = [1, 1]} : vector<7x256xf32> to vector<1x256xf32>
    %53 = vector.broadcast %52 : vector<1x256xf32> to vector<8x256xf32>
    %54 = arith.addf %51, %53 : vector<8x256xf32>
    %cst_27 = arith.constant 0.000000e+00 : f32
    %55 = vector.broadcast %cst_27 : f32 to vector<8x256xf32>
    %56 = arith.maximumf %54, %55 : vector<8x256xf32>
    %57 = arith.truncf %56 : vector<8x256xf32> to vector<8x256xbf16>
    %c0_28 = arith.constant 0 : index
    %c0_29 = arith.constant 0 : index
    %58 = vector.load %arg5[%c0_28, %c0_29] : memref<256x4xbf16, #tpu.memory_space<vmem>>, vector<256x4xbf16>
    %cst_30 = arith.constant dense<0.000000e+00> : vector<8x4xf32>
    %59 = tpu.matmul %57, %58, %cst_30 {dimension_numbers = #tpu.dot_dimension_numbers<[1], [0], [0], [1], [0, 0, 1, 1], [], []>} : vector<8x256xbf16>, vector<256x4xbf16>, vector<8x4xf32> -> vector<8x4xf32>
    %60 = vector.extract_strided_slice %0 {offsets = [6, 0], sizes = [1, 4], strides = [1, 1]} : vector<7x256xf32> to vector<1x4xf32>
    %61 = vector.broadcast %60 : vector<1x4xf32> to vector<8x4xf32>
    %62 = arith.addf %59, %61 : vector<8x4xf32>
    %c0_31 = arith.constant 0 : index
    %c0_32 = arith.constant 0 : index
    %63 = vector.load %arg6[%c0_31, %c0_32] : memref<8x4xf32, #tpu.memory_space<vmem>>, vector<8x4xf32>
    tpu.vector_store %arg6[%c0_31, %c0_32], %62 {strides = array<i32>} : memref<8x4xf32, #tpu.memory_space<vmem>>, vector<8x4xf32>,
    return
  }
  func.func @transform_0(%arg0: i32) -> (i32, i32) {
    %c0_i32 = arith.constant 0 : i32
    %c0_i32_0 = arith.constant 0 : i32
    return %arg0, %c0_i32 : i32, i32
  }
  func.func @transform_1(%arg0: i32) -> (i32, i32) {
    %c0_i32 = arith.constant 0 : i32
    %c0_i32_0 = arith.constant 0 : i32
    %c0_i32_1 = arith.constant 0 : i32
    return %c0_i32, %c0_i32_0 : i32, i32
  }
  func.func @transform_2(%arg0: i32) -> (i32, i32, i32) {
    %c0_i32 = arith.constant 0 : i32
    %c0_i32_0 = arith.constant 0 : i32
    %c0_i32_1 = arith.constant 0 : i32
    %c0_i32_2 = arith.constant 0 : i32
    return %c0_i32, %c0_i32_0, %c0_i32_1 : i32, i32, i32
  }
  func.func @transform_3(%arg0: i32) -> (i32, i32) {
    %c0_i32 = arith.constant 0 : i32
    %c0_i32_0 = arith.constant 0 : i32
    %c0_i32_1 = arith.constant 0 : i32
    return %c0_i32, %c0_i32_0 : i32, i32
  }
  func.func @transform_4(%arg0: i32) -> (i32, i32) {
    %c0_i32 = arith.constant 0 : i32
    %c0_i32_0 = arith.constant 0 : i32
    %c0_i32_1 = arith.constant 0 : i32
    return %c0_i32, %c0_i32_0 : i32, i32
  }
  func.func @transform_5(%arg0: i32) -> (i32, i32) {
    %c0_i32 = arith.constant 0 : i32
    %c0_i32_0 = arith.constant 0 : i32
    return %arg0, %c0_i32 : i32, i32
  }
}

</mosaic_0001>

<bundles_post_ra>
// kernel: tpu_custom_call.1
= control target key start
LH: loop header
LB: loop body
LE: loop exit
PB: predicated region body
PF: predicated region fallthrough
CT: control target
= control target key end

     0   :  { %10 = vsyncpa [#allocation3], 0  ;;  %s2005_s18 = smov [#allocation2]   ;;  %s2131_s0 = inlined_call_operand.vmem [shape: f32[8,6], index: 0, kind: input, shape index: {}]   ;;  %s2132_s1 = inlined_call_operand.vmem [shape: bf16[8,256], index: 1, kind: input, shape index: {}]   ;;  %s2133_s2 = inlined_call_operand.hbm [shape: bf16[5,256,256], index: 2, kind: input, shape index: {}]   ;;  %s2134_s3 = inlined_call_operand.vmem [shape: f32[7,256], index: 3, kind: input, shape index: {}]   ;;  %s2135_s4 = inlined_call_operand.vmem [shape: bf16[256,4], index: 4, kind: input, shape index: {}]   ;;  %s2136_s5 = inlined_call_operand.vmem [shape: f32[8,4], index: 5, kind: output, shape index: {}]  }
   0x1   :  { %s20_s19 = sshll.u32 %s2005_s18, 4  ;;  %s21_s19 = int_to_ptr.vmem [resolvable:$true] %s20_s19 }
   0x2   :  { %s1991_s20 = scalar_lea.vmem %s21_s19, 20480  ;;  %p1996_p1 = scmp.lt.s32.totalorder %s21_s19, %s21_s19 }
   0x3   :  { %p1992_p0 = scmp.ne.s32.totalorder %s21_s19, %s1991_s20  ;;  %p1997_p2 = scmp.lt.s32.totalorder %s1991_s20, %s1991_s20 }
   0x5   :  { %p1998_p3 = por %p1997_p2, %p1996_p1 }
   0x7   :  { %p1999_p4 = pnand %p1998_p3, %p1992_p0 }
   0x9   :  { %2002 = shalt.err (!%p1999_p4)
}
   0xa   :  { %s2006_s21 = smov 128   ;;  %s2007_s22 = smov 8  }
   0xb   :  { %26 = dma.hbm_to_vmem [thread:$0]  %s2133_s2, 20480, %s21_s19, [#allocation3], %s2006_s21, %s2006_s21, %s2007_s22  }
   0xc   :  { %2003 = dma.done.wait [#allocation3], 20480  }
   0xd   :  { %2004 = vsyncadd [#allocation3], 4294946816  ;;  %v2008_v0 = vmov 0   ;;  %vm38_vm0 = vcmask 48128   ;;  %v41_v1 = vld [vmem:[%s2132_s1] sm:$0xff]  ;;  %vm59_vm1 = vcmask 1043456  }
   0xe   :  { %98 = vmatprep.mubr.bf16.mxu0 %v2008_v0  ;;  %v37_v2 = vld [vmem:[%s2131_s0] sm:$0xff]  ;;  %v1520_v3 = vcombine.high %v41_v1, %v41_v1  ;;  %v1519_v4 = vcombine.low %v41_v1, %v41_v1  ;;  %v1727_v6 = vld [vmem:[#allocation2 + $0x74] ss:$8 sps:$4 sm:$0xff]   ;;  %v1729_v7 = vld [vmem:[#allocation2 + $0x70] ss:$8 sps:$4 sm:$0xff]   ;;  %vm55_vm2 = vcmask 64512  }
   0xf   :  { %v39_v5 = vsel %vm38_vm0, %v37_v2, 0.0  ;;  %v1730_v8 = vld [vmem:[#allocation2 + $0x64] ss:$8 sps:$4 sm:$0xff]   ;;  %311 = vmatprep.subr.bf16.mxu1 %v1727_v6  ;;  %v1732_v11 = vld [vmem:[#allocation2 + $0x60] ss:$8 sps:$4 sm:$0xff]   ;;  %vm1512_vm3 = vcmask 31744  }
  0x10   :  { %1521 = vmatprep.subr.msk.bf16.mxu0 %vm59_vm1, %v1520_v3  ;;  %v61_v9 = vsel %vm59_vm1, %v1519_v4, 0  ;;  %v40_v10 = vpack.c.bf16 %v39_v5, %v39_v5  ;;  %312 = vmatpush1.bf16.msra.mxu1 %v1729_v7  ;;  %v1733_v12 = vld [vmem:[#allocation2 + $0x54] ss:$8 sps:$4 sm:$0xff]   ;;  %v1735_v13 = vld [vmem:[#allocation2 + $0x50] ss:$8 sps:$4 sm:$0xff]   ;;  %v42_v4 = vlaneseq }
  0x11   :  { %81 = vmatpush1.bf16.msra.mxu0 %v61_v9  ;;  %313 = vmatprep.subr.bf16.mxu1 %v1730_v8  ;;  %v1736_v14 = vld [vmem:[#allocation2 + $0x44] ss:$8 sps:$4 sm:$0xff]   ;;  %v1738_v15 = vld [vmem:[#allocation2 + $0x40] ss:$8 sps:$4 sm:$0xff]   ;;  %v1739_v16 = vld [vmem:[#allocation2 + $0x34] ss:$8 sps:$4 sm:$0xff]  }
  0x12   :  { %v1741_v17 = vld [vmem:[#allocation2 + $0x30] ss:$8 sps:$4 sm:$0xff]   ;;  %v1742_v18 = vld [vmem:[#allocation2 + $0x24] ss:$8 sps:$4 sm:$0xff]   ;;  %v1744_v19 = vld [vmem:[#allocation2 + $0x20] ss:$8 sps:$4 sm:$0xff]  }
  0x13   :  { %v1745_v20 = vld [vmem:[#allocation2 + $0x14] ss:$8 sps:$4 sm:$0xff]   ;;  %v1747_v21 = vld [vmem:[#allocation2 + $0x10] ss:$8 sps:$4 sm:$0xff]   ;;  %v1748_v22 = vld [vmem:[#allocation2 + $0x4] ss:$8 sps:$4 sm:$0xff]  }
  0x14   :  { %1522 = vmatmul.mubr.msk.bf16.vlgmr.msra.gmra.mxu0 %vm55_vm2, %v40_v10  ;;  %314 = vmatpush1.bf16.msra.mxu1 %v1732_v11  ;;  %v1750_v23 = vld [vmem:[#allocation2] ss:$8 sps:$4 sm:$0xff]   ;;  %v1751_v24 = vld [vmem:[#allocation2 + $0xf4] ss:$8 sps:$4 sm:$0xff]   ;;  %v1753_v25 = vld [vmem:[#allocation2 + $0xf0] ss:$8 sps:$4 sm:$0xff]  }
  0x15   :  { %315 = vmatprep.subr.bf16.mxu1 %v1733_v12  ;;  %v1754_v26 = vld [vmem:[#allocation2 + $0xe4] ss:$8 sps:$4 sm:$0xff]   ;;  %v1756_v27 = vld [vmem:[#allocation2 + $0xe0] ss:$8 sps:$4 sm:$0xff]   ;;  %v1757_v28 = vld [vmem:[#allocation2 + $0xd4] ss:$8 sps:$4 sm:$0xff]  }
  0x16   :  { %v1759_v29 = vld [vmem:[#allocation2 + $0xd0] ss:$8 sps:$4 sm:$0xff]   ;;  %v1760_v30 = vld [vmem:[#allocation2 + $0xc4] ss:$8 sps:$4 sm:$0xff]   ;;  %v1762_v31 = vld [vmem:[#allocation2 + $0xc0] ss:$8 sps:$4 sm:$0xff]  }
  0x17   :  { %v1763_v32 = vld [vmem:[#allocation2 + $0xb4] ss:$8 sps:$4 sm:$0xff]   ;;  %v1765_v33 = vld [vmem:[#allocation2 + $0xb0] ss:$8 sps:$4 sm:$0xff]   ;;  %v1766_v34 = vld [vmem:[#allocation2 + $0xa4] ss:$8 sps:$4 sm:$0xff]  }
  0x18   :  { %316 = vmatpush1.bf16.msra.mxu1 %v1735_v13  ;;  %v1768_v35 = vld [vmem:[#allocation2 + $0xa0] ss:$8 sps:$4 sm:$0xff]   ;;  %v1769_v36 = vld [vmem:[#allocation2 + $0x94] ss:$8 sps:$4 sm:$0xff]   ;;  %v1771_v37 = vld [vmem:[#allocation2 + $0x90] ss:$8 sps:$4 sm:$0xff]  }
  0x19   :  { %317 = vmatprep.subr.bf16.mxu1 %v1736_v14  ;;  %v1772_v38 = vld [vmem:[#allocation2 + $0x84] ss:$8 sps:$4 sm:$0xff]   ;;  %v1774_v39 = vld [vmem:[#allocation2 + $0x80] ss:$8 sps:$4 sm:$0xff]   ;;  %v1775_v40 = vld [vmem:[#allocation2 + $0x170] ss:$8 sps:$4 sm:$0xff]  }
  0x1a   :  { %v1777_v41 = vld [vmem:[#allocation2 + $0x174] ss:$8 sps:$4 sm:$0xff]   ;;  %v1780_v42 = vld [vmem:[#allocation2 + $0x164] ss:$8 sps:$4 sm:$0xff]   ;;  %v1778_v43 = vld [vmem:[#allocation2 + $0x160] ss:$8 sps:$4 sm:$0xff]  }
  0x1b   :  { %557 = vmatprep.subr.bf16.mxu0 %v1777_v41  ;;  %v1783_v44 = vld [vmem:[#allocation2 + $0x154] ss:$8 sps:$4 sm:$0xff]   ;;  %v1781_v45 = vld [vmem:[#allocation2 + $0x150] ss:$8 sps:$4 sm:$0xff]   ;;  %v1786_v46 = vld [vmem:[#allocation2 + $0x144] ss:$8 sps:$4 sm:$0xff]  }
  0x1c   :  { %318 = vmatpush1.bf16.msra.mxu1 %v1738_v15  ;;  %558 = vmatpush1.bf16.msra.mxu0 %v1775_v40  ;;  %v1784_v47 = vld [vmem:[#allocation2 + $0x140] ss:$8 sps:$4 sm:$0xff]   ;;  %v1789_v48 = vld [vmem:[#allocation2 + $0x134] ss:$8 sps:$4 sm:$0xff]   ;;  %v1787_v49 = vld [vmem:[#allocation2 + $0x130] ss:$8 sps:$4 sm:$0xff]  }
  0x1d   :  { %319 = vmatprep.subr.bf16.mxu1 %v1739_v16  ;;  %559 = vmatprep.subr.bf16.mxu0 %v1780_v42  ;;  %v1792_v50 = vld [vmem:[#allocation2 + $0x124] ss:$8 sps:$4 sm:$0xff]   ;;  %v1790_v51 = vld [vmem:[#allocation2 + $0x120] ss:$8 sps:$4 sm:$0xff]   ;;  %v1795_v52 = vld [vmem:[#allocation2 + $0x114] ss:$8 sps:$4 sm:$0xff]  }
  0x1e   :  { %v1793_v53 = vld [vmem:[#allocation2 + $0x110] ss:$8 sps:$4 sm:$0xff]   ;;  %v1798_v54 = vld [vmem:[#allocation2 + $0x104] ss:$8 sps:$4 sm:$0xff]   ;;  %v1796_v55 = vld [vmem:[#allocation2 + $0x100] ss:$8 sps:$4 sm:$0xff]  }
  0x1f   :  { %v1801_v56 = vld [vmem:[#allocation2 + $0x1f4] ss:$8 sps:$4 sm:$0xff]   ;;  %v1799_v57 = vld [vmem:[#allocation2 + $0x1f0] ss:$8 sps:$4 sm:$0xff]   ;;  %v1804_v58 = vld [vmem:[#allocation2 + $0x1e4] ss:$8 sps:$4 sm:$0xff]  }
  0x20   :  { %320 = vmatpush1.bf16.msra.mxu1 %v1741_v17  ;;  %560 = vmatpush1.bf16.msra.mxu0 %v1778_v43  ;;  %v1802_v59 = vld [vmem:[#allocation2 + $0x1e0] ss:$8 sps:$4 sm:$0xff]   ;;  %v1807_v60 = vld [vmem:[#allocation2 + $0x1d4] ss:$8 sps:$4 sm:$0xff]   ;;  %v1805_v61 = vld [vmem:[#allocation2 + $0x1d0] ss:$8 sps:$4 sm:$0xff]  }
  0x21   :  { %321 = vmatprep.subr.bf16.mxu1 %v1742_v18  ;;  %561 = vmatprep.subr.bf16.mxu0 %v1783_v44  ;;  %v1810_v62 = vld [vmem:[#allocation2 + $0x1c4] ss:$8 sps:$4 sm:$0xff]   ;;  %v1808_v63 = vld [vmem:[#allocation2 + $0x1c0] ss:$8 sps:$4 sm:$0xff]   ;;  %v1813_v0 = vld [vmem:[#allocation2 + $0x1b4] ss:$8 sps:$4 sm:$0xff]  }
  0x22   :  { %v1811_v1 = vld [vmem:[#allocation2 + $0x1b0] ss:$8 sps:$4 sm:$0xff]   ;;  %v1816_v2 = vld [vmem:[#allocation2 + $0x1a4] ss:$8 sps:$4 sm:$0xff]   ;;  %v1814_v3 = vld [vmem:[#allocation2 + $0x1a0] ss:$8 sps:$4 sm:$0xff]  }
  0x23   :  { %v2048_v5 = vshrl.u32 %v42_v4, 7  ;;  %v2054_v7 = vld [vmem:[%s2134_s3] sm:$0x7f]  ;;  %v2059_v8 = vld [vmem:[%s2134_s3 + $0x8] sm:$0x7f] }
  0x24   :  { %322 = vmatpush1.bf16.msra.mxu1 %v1744_v19  ;;  %562 = vmatpush1.bf16.msra.mxu0 %v1781_v45  ;;  %v1844_v40 = vld [vmem:[#allocation2 + $0x200] ss:$8 sps:$4 sm:$0xff]   ;;  %v1849_v41 = vld [vmem:[#allocation2 + $0x2f4] ss:$8 sps:$4 sm:$0xff]   ;;  %v1847_v42 = vld [vmem:[#allocation2 + $0x2f0] ss:$8 sps:$4 sm:$0xff]  }
  0x25   :  { %323 = vmatprep.subr.bf16.mxu1 %v1745_v20  ;;  %563 = vmatprep.subr.bf16.mxu0 %v1786_v46  ;;  %v44_v6 = vsub.s32 0, %v2048_v5  ;;  %v1852_v43 = vld [vmem:[#allocation2 + $0x2e4] ss:$8 sps:$4 sm:$0xff]   ;;  %v1850_v44 = vld [vmem:[#allocation2 + $0x2e0] ss:$8 sps:$4 sm:$0xff]  }
  0x26   :  { %v1855_v45 = vld [vmem:[#allocation2 + $0x2d4] ss:$8 sps:$4 sm:$0xff]   ;;  %v1853_v46 = vld [vmem:[#allocation2 + $0x2d0] ss:$8 sps:$4 sm:$0xff]   ;;  %v1870_v4 = vld [vmem:[#allocation2 + $0x284] ss:$8 sps:$4 sm:$0xff]  }
  0x27   :  { %v45_v9 = vrot.slane %v2054_v7, %v44_v6  ;;  %v49_v10 = vrot.slane %v2059_v8, %v44_v6  ;;  %v1868_v6 = vld [vmem:[#allocation2 + $0x280] ss:$8 sps:$4 sm:$0xff]  }
  0x28   :  { %324 = vmatpush1.bf16.msra.mxu1 %v1747_v21  ;;  %564 = vmatpush1.bf16.msra.mxu0 %v1784_v47  ;;  %v1819_v21 = vld [vmem:[#allocation2 + $0x194] ss:$8 sps:$4 sm:$0xff]   ;;  %v1858_v47 = vld [vmem:[#allocation2 + $0x2c4] ss:$8 sps:$4 sm:$0xff]  }
  0x29   :  { %325 = vmatprep.subr.bf16.mxu1 %v1748_v22  ;;  %565 = vmatprep.subr.bf16.mxu0 %v1789_v48  ;;  %v1817_v22 = vld [vmem:[#allocation2 + $0x190] ss:$8 sps:$4 sm:$0xff]   ;;  %v1856_v48 = vld [vmem:[#allocation2 + $0x2c0] ss:$8 sps:$4 sm:$0xff]  }
  0x2c   :  { %326 = vmatpush1.bf16.msra.mxu1 %v1750_v23  ;;  %566 = vmatpush1.bf16.msra.mxu0 %v1787_v49  ;;  %v1822_v23 = vld [vmem:[#allocation2 + $0x184] ss:$8 sps:$4 sm:$0xff]   ;;  %v1861_v49 = vld [vmem:[#allocation2 + $0x2b4] ss:$8 sps:$4 sm:$0xff]  }
  0x2d   :  { %327 = vmatprep.subr.bf16.mxu1 %v1751_v24  ;;  %567 = vmatprep.subr.bf16.mxu0 %v1792_v50  ;;  %v1820_v24 = vld [vmem:[#allocation2 + $0x180] ss:$8 sps:$4 sm:$0xff]   ;;  %v1859_v50 = vld [vmem:[#allocation2 + $0x2b0] ss:$8 sps:$4 sm:$0xff]  }
  0x30   :  { %328 = vmatpush2.bf16.msra.mxu1 %v1753_v25  ;;  %568 = vmatpush1.bf16.msra.mxu0 %v1790_v51  ;;  %v1823_v25 = vld [vmem:[#allocation2 + $0x270] ss:$8 sps:$4 sm:$0xff]   ;;  %v1864_v51 = vld [vmem:[#allocation2 + $0x2a4] ss:$8 sps:$4 sm:$0xff]  }
  0x31   :  { %329 = vmatprep.subr.bf16.mxu1 %v1754_v26  ;;  %569 = vmatprep.subr.bf16.mxu0 %v1795_v52  ;;  %v1825_v26 = vld [vmem:[#allocation2 + $0x274] ss:$8 sps:$4 sm:$0xff]   ;;  %v1862_v52 = vld [vmem:[#allocation2 + $0x2a0] ss:$8 sps:$4 sm:$0xff]  }
  0x34   :  { %330 = vmatpush2.bf16.msra.mxu1 %v1756_v27  ;;  %570 = vmatpush1.bf16.msra.mxu0 %v1793_v53  ;;  %v1828_v27 = vld [vmem:[#allocation2 + $0x264] ss:$8 sps:$4 sm:$0xff]   ;;  %v145_v53 = vsub.s32 1, %v2048_v5 }
  0x35   :  { %331 = vmatprep.subr.bf16.mxu1 %v1757_v28  ;;  %571 = vmatprep.subr.bf16.mxu0 %v1798_v54  ;;  %v1826_v28 = vld [vmem:[#allocation2 + $0x260] ss:$8 sps:$4 sm:$0xff]  }
  0x36   :  { %v146_v54 = vrot.slane %v2054_v7, %v145_v53 }
  0x38   :  { %332 = vmatpush2.bf16.msra.mxu1 %v1759_v29  ;;  %572 = vmatpush1.bf16.msra.mxu0 %v1796_v55  ;;  %v1831_v29 = vld [vmem:[#allocation2 + $0x254] ss:$8 sps:$4 sm:$0xff]   ;;  %v150_v55 = vrot.slane %v2059_v8, %v145_v53  ;;  %v1916_v53 = vld [vmem:[#allocation2 + $0x380] ss:$8 sps:$4 sm:$0xff]  }
  0x39   :  { %333 = vmatprep.subr.bf16.mxu1 %v1760_v30  ;;  %573 = vmatprep.subr.bf16.mxu0 %v1801_v56  ;;  %v1829_v30 = vld [vmem:[#allocation2 + $0x250] ss:$8 sps:$4 sm:$0xff]  }
  0x3c   :  { %334 = vmatpush2.bf16.msra.mxu1 %v1762_v31  ;;  %574 = vmatpush2.bf16.msra.mxu0 %v1799_v57  ;;  %v1834_v31 = vld [vmem:[#allocation2 + $0x244] ss:$8 sps:$4 sm:$0xff]  }
  0x3d   :  { %335 = vmatprep.subr.bf16.mxu1 %v1763_v32  ;;  %575 = vmatprep.subr.bf16.mxu0 %v1804_v58  ;;  %v1832_v32 = vld [vmem:[#allocation2 + $0x240] ss:$8 sps:$4 sm:$0xff]  }
  0x40   :  { %336 = vmatpush2.bf16.msra.mxu1 %v1765_v33  ;;  %576 = vmatpush2.bf16.msra.mxu0 %v1802_v59  ;;  %v1837_v33 = vld [vmem:[#allocation2 + $0x234] ss:$8 sps:$4 sm:$0xff]  }
  0x41   :  { %337 = vmatprep.subr.bf16.mxu1 %v1766_v34  ;;  %577 = vmatprep.subr.bf16.mxu0 %v1807_v60  ;;  %v1835_v34 = vld [vmem:[#allocation2 + $0x230] ss:$8 sps:$4 sm:$0xff]  }
  0x44   :  { %338 = vmatpush2.bf16.msra.mxu1 %v1768_v35  ;;  %578 = vmatpush2.bf16.msra.mxu0 %v1805_v61  ;;  %v1840_v35 = vld [vmem:[#allocation2 + $0x224] ss:$8 sps:$4 sm:$0xff]  }
  0x45   :  { %339 = vmatprep.subr.bf16.mxu1 %v1769_v36  ;;  %579 = vmatprep.subr.bf16.mxu0 %v1810_v62  ;;  %v1838_v36 = vld [vmem:[#allocation2 + $0x220] ss:$8 sps:$4 sm:$0xff]  }
  0x48   :  { %340 = vmatpush2.bf16.msra.mxu1 %v1771_v37  ;;  %580 = vmatpush2.bf16.msra.mxu0 %v1808_v63  ;;  %v1843_v37 = vld [vmem:[#allocation2 + $0x214] ss:$8 sps:$4 sm:$0xff]  }
  0x49   :  { %341 = vmatprep.subr.bf16.mxu1 %v1772_v38  ;;  %581 = vmatprep.subr.bf16.mxu0 %v1813_v0  ;;  %v1841_v38 = vld [vmem:[#allocation2 + $0x210] ss:$8 sps:$4 sm:$0xff]  }
  0x4c   :  { %342 = vmatpush2.bf16.msra.mxu1 %v1774_v39  ;;  %582 = vmatpush2.bf16.msra.mxu0 %v1811_v1  ;;  %v1846_v39 = vld [vmem:[#allocation2 + $0x204] ss:$8 sps:$4 sm:$0xff]  }
  0x4d   :  { %583 = vmatprep.subr.bf16.mxu0 %v1816_v2  ;;  %803 = vmatprep.subr.bf16.mxu1 %v1825_v26  ;;  %v1867_v2 = vld [vmem:[#allocation2 + $0x294] ss:$8 sps:$4 sm:$0xff]   ;;  %v1895_v26 = vld [vmem:[#allocation2 + $0x3f0] ss:$8 sps:$4 sm:$0xff]  }
  0x50   :  { %584 = vmatpush2.bf16.msra.mxu0 %v1814_v3  ;;  %v1865_v3 = vld [vmem:[#allocation2 + $0x290] ss:$8 sps:$4 sm:$0xff]  }
  0x51   :  { %585 = vmatprep.subr.bf16.mxu0 %v1819_v21  ;;  %v1891_v21 = vld [vmem:[#allocation2 + $0x314] ss:$8 sps:$4 sm:$0xff]  }
  0x54   :  { %586 = vmatpush2.bf16.msra.mxu0 %v1817_v22  ;;  %v1889_v22 = vld [vmem:[#allocation2 + $0x310] ss:$8 sps:$4 sm:$0xff]  }
  0x55   :  { %587 = vmatprep.subr.bf16.mxu0 %v1822_v23  ;;  %v1894_v23 = vld [vmem:[#allocation2 + $0x304] ss:$8 sps:$4 sm:$0xff]  }
  0x58   :  { %588 = vmatpush2.bf16.msra.mxu0 %v1820_v24  ;;  %v1892_v24 = vld [vmem:[#allocation2 + $0x300] ss:$8 sps:$4 sm:$0xff]  }
  0xd4   :  { %v100_v11 = vpop.f32.mrf.mxu0 }
  0xd5   :  { %v101_v12 = vadd.f32 %v100_v11, %v45_v9  ;;  %v1871_v9 = vld [vmem:[#allocation2 + $0x370] ss:$8 sps:$4 sm:$0xff]   ;;  %v1876_v11 = vld [vmem:[#allocation2 + $0x364] ss:$8 sps:$4 sm:$0xff]  }
  0xd6   :  { %v102_v13 = vpop.f32.mrf.mxu0 }
  0xd7   :  { %v103_v14 = vadd.f32 %v102_v13, %v49_v10  ;;  %v107_v15 = vmax.f32 %v101_v12, 0.0  ;;  %v1873_v10 = vld [vmem:[#allocation2 + $0x374] ss:$8 sps:$4 sm:$0xff]   ;;  %v1874_v12 = vld [vmem:[#allocation2 + $0x360] ss:$8 sps:$4 sm:$0xff]  }
  0xd8   :  { %v104_v16 = vpop.f32.mrf.mxu0  ;;  %1049 = vmatprep.subr.bf16.mxu0 %v1873_v10  ;;  %v1879_v13 = vld [vmem:[#allocation2 + $0x354] ss:$8 sps:$4 sm:$0xff]   ;;  %v1943_v10 = vld [vmem:[#allocation2 + $0x4f0] ss:$8 sps:$4 sm:$0xff]  }
  0xd9   :  { %v108_v17 = vmax.f32 %v103_v14, 0.0  ;;  %v109_v20 = vpack.c.bf16 %v107_v15, %v107_v15  ;;  %v1877_v14 = vld [vmem:[#allocation2 + $0x350] ss:$8 sps:$4 sm:$0xff]   ;;  %v1882_v15 = vld [vmem:[#allocation2 + $0x344] ss:$8 sps:$4 sm:$0xff]  }
  0xda   :  { %v105_v18 = vpop.f32.mrf.mxu0  ;;  %v1880_v16 = vld [vmem:[#allocation2 + $0x340] ss:$8 sps:$4 sm:$0xff]  }
  0xdb   :  { %v110_v19 = vpack.c.bf16 %v108_v17, %v108_v17  ;;  %v1885_v17 = vld [vmem:[#allocation2 + $0x334] ss:$8 sps:$4 sm:$0xff]   ;;  %v1883_v18 = vld [vmem:[#allocation2 + $0x330] ss:$8 sps:$4 sm:$0xff]  }
  0xdd   :  { %343 = vmatprep.mubr.bf16.mxu1 %v110_v19  ;;  %v1888_v19 = vld [vmem:[#allocation2 + $0x324] ss:$8 sps:$4 sm:$0xff]  }
  0xde   :  { %344 = vmatmul.mubr.bf16.vlgmr.msra.gmra.mxu1 %v109_v20  ;;  %v1886_v20 = vld [vmem:[#allocation2 + $0x320] ss:$8 sps:$4 sm:$0xff]  }
  0xdf   :  { %804 = vmatpush1.bf16.msra.mxu1 %v1823_v25  ;;  %v1897_v25 = vld [vmem:[#allocation2 + $0x3f4] ss:$8 sps:$4 sm:$0xff]  }
  0xe0   :  { %805 = vmatprep.subr.bf16.mxu1 %v1828_v27  ;;  %v1900_v27 = vld [vmem:[#allocation2 + $0x3e4] ss:$8 sps:$4 sm:$0xff]  }
  0xe3   :  { %806 = vmatpush1.bf16.msra.mxu1 %v1826_v28  ;;  %v1898_v28 = vld [vmem:[#allocation2 + $0x3e0] ss:$8 sps:$4 sm:$0xff]  }
  0xe4   :  { %807 = vmatprep.subr.bf16.mxu1 %v1831_v29  ;;  %v1903_v29 = vld [vmem:[#allocation2 + $0x3d4] ss:$8 sps:$4 sm:$0xff]  }
  0xe7   :  { %808 = vmatpush1.bf16.msra.mxu1 %v1829_v30  ;;  %v1901_v30 = vld [vmem:[#allocation2 + $0x3d0] ss:$8 sps:$4 sm:$0xff]  }
  0xe8   :  { %809 = vmatprep.subr.bf16.mxu1 %v1834_v31  ;;  %v1906_v31 = vld [vmem:[#allocation2 + $0x3c4] ss:$8 sps:$4 sm:$0xff]  }
  0xeb   :  { %810 = vmatpush1.bf16.msra.mxu1 %v1832_v32  ;;  %v1904_v32 = vld [vmem:[#allocation2 + $0x3c0] ss:$8 sps:$4 sm:$0xff]  }
  0xec   :  { %811 = vmatprep.subr.bf16.mxu1 %v1837_v33  ;;  %v1909_v33 = vld [vmem:[#allocation2 + $0x3b4] ss:$8 sps:$4 sm:$0xff]  }
  0xef   :  { %812 = vmatpush1.bf16.msra.mxu1 %v1835_v34  ;;  %v1907_v34 = vld [vmem:[#allocation2 + $0x3b0] ss:$8 sps:$4 sm:$0xff]  }
  0xf0   :  { %813 = vmatprep.subr.bf16.mxu1 %v1840_v35  ;;  %v1912_v35 = vld [vmem:[#allocation2 + $0x3a4] ss:$8 sps:$4 sm:$0xff]  }
  0xf3   :  { %814 = vmatpush1.bf16.msra.mxu1 %v1838_v36  ;;  %v1910_v36 = vld [vmem:[#allocation2 + $0x3a0] ss:$8 sps:$4 sm:$0xff]  }
  0xf4   :  { %815 = vmatprep.subr.bf16.mxu1 %v1843_v37  ;;  %v391_v37 = vsub.s32 2, %v2048_v5 }
  0xf7   :  { %816 = vmatpush1.bf16.msra.mxu1 %v1841_v38  ;;  %v392_v38 = vrot.slane %v2054_v7, %v391_v37 }
  0xf8   :  { %817 = vmatprep.subr.bf16.mxu1 %v1846_v39  ;;  %v396_v39 = vrot.slane %v2059_v8, %v391_v37  ;;  %v1964_v37 = vld [vmem:[#allocation2 + $0x480] ss:$8 sps:$4 sm:$0xff]  }
  0xfb   :  { %818 = vmatpush1.bf16.msra.mxu1 %v1844_v40 }
  0xfc   :  { %819 = vmatprep.subr.bf16.mxu1 %v1849_v41 }
  0xff   :  { %820 = vmatpush2.bf16.msra.mxu1 %v1847_v42 }
 0x100   :  { %821 = vmatprep.subr.bf16.mxu1 %v1852_v43 }
 0x103   :  { %822 = vmatpush2.bf16.msra.mxu1 %v1850_v44 }
 0x104   :  { %823 = vmatprep.subr.bf16.mxu1 %v1855_v45 }
 0x107   :  { %824 = vmatpush2.bf16.msra.mxu1 %v1853_v46 }
 0x108   :  { %825 = vmatprep.subr.bf16.mxu1 %v1858_v47 }
 0x10b   :  { %826 = vmatpush2.bf16.msra.mxu1 %v1856_v48 }
 0x10c   :  { %827 = vmatprep.subr.bf16.mxu1 %v1861_v49 }
 0x10f   :  { %828 = vmatpush2.bf16.msra.mxu1 %v1859_v50  ;;  %v1915_v50 = vld [vmem:[#allocation2 + $0x394] ss:$8 sps:$4 sm:$0xff]  }
 0x110   :  { %829 = vmatprep.subr.bf16.mxu1 %v1864_v51  ;;  %v1913_v51 = vld [vmem:[#allocation2 + $0x390] ss:$8 sps:$4 sm:$0xff]  }
 0x113   :  { %830 = vmatpush2.bf16.msra.mxu1 %v1862_v52  ;;  %v1918_v52 = vld [vmem:[#allocation2 + $0x384] ss:$8 sps:$4 sm:$0xff]  }
 0x114   :  { %831 = vmatprep.subr.bf16.mxu1 %v1867_v2  ;;  %v1939_v2 = vld [vmem:[#allocation2 + $0x414] ss:$8 sps:$4 sm:$0xff]  }
 0x117   :  { %832 = vmatpush2.bf16.msra.mxu1 %v1865_v3  ;;  %v1937_v3 = vld [vmem:[#allocation2 + $0x410] ss:$8 sps:$4 sm:$0xff]  }
 0x118   :  { %833 = vmatprep.subr.bf16.mxu1 %v1870_v4  ;;  %v1942_v4 = vld [vmem:[#allocation2 + $0x404] ss:$8 sps:$4 sm:$0xff]  }
 0x11b   :  { %834 = vmatpush2.bf16.msra.mxu1 %v1868_v6  ;;  %v1940_v6 = vld [vmem:[#allocation2 + $0x400] ss:$8 sps:$4 sm:$0xff]  }
 0x19e   :  { %v345_v56 = vpop.f32.mrf.mxu1 }
 0x19f   :  { %v346_v57 = vadd.f32 %v345_v56, %v146_v54  ;;  %v1919_v54 = vld [vmem:[#allocation2 + $0x470] ss:$8 sps:$4 sm:$0xff]   ;;  %v1924_v56 = vld [vmem:[#allocation2 + $0x464] ss:$8 sps:$4 sm:$0xff]  }
 0x1a0   :  { %v347_v58 = vpop.f32.mrf.mxu1 }
 0x1a1   :  { %v348_v59 = vadd.f32 %v347_v58, %v150_v55  ;;  %v352_v60 = vmax.f32 %v346_v57, 0.0  ;;  %v1921_v55 = vld [vmem:[#allocation2 + $0x474] ss:$8 sps:$4 sm:$0xff]   ;;  %v1922_v57 = vld [vmem:[#allocation2 + $0x460] ss:$8 sps:$4 sm:$0xff]  }
 0x1a2   :  { %v349_v61 = vpop.f32.mrf.mxu1  ;;  %1295 = vmatprep.subr.bf16.mxu1 %v1921_v55  ;;  %v1927_v58 = vld [vmem:[#allocation2 + $0x454] ss:$8 sps:$4 sm:$0xff]  }
 0x1a3   :  { %v353_v62 = vmax.f32 %v348_v59, 0.0  ;;  %v354_v1 = vpack.c.bf16 %v352_v60, %v352_v60  ;;  %v1925_v59 = vld [vmem:[#allocation2 + $0x450] ss:$8 sps:$4 sm:$0xff]   ;;  %v1930_v60 = vld [vmem:[#allocation2 + $0x444] ss:$8 sps:$4 sm:$0xff]  }
 0x1a4   :  { %v350_v63 = vpop.f32.mrf.mxu1  ;;  %v1928_v61 = vld [vmem:[#allocation2 + $0x440] ss:$8 sps:$4 sm:$0xff]  }
 0x1a5   :  { %v355_v0 = vpack.c.bf16 %v353_v62, %v353_v62  ;;  %v1933_v62 = vld [vmem:[#allocation2 + $0x434] ss:$8 sps:$4 sm:$0xff]   ;;  %v1931_v63 = vld [vmem:[#allocation2 + $0x430] ss:$8 sps:$4 sm:$0xff]  }
 0x1a7   :  { %589 = vmatprep.mubr.bf16.mxu0 %v355_v0  ;;  %v1936_v0 = vld [vmem:[#allocation2 + $0x424] ss:$8 sps:$4 sm:$0xff]  }
 0x1a8   :  { %590 = vmatmul.mubr.bf16.vlgmr.msra.gmra.mxu0 %v354_v1  ;;  %v1934_v1 = vld [vmem:[#allocation2 + $0x420] ss:$8 sps:$4 sm:$0xff]  }
 0x1a9   :  { %1050 = vmatpush1.bf16.msra.mxu0 %v1871_v9  ;;  %v1945_v9 = vld [vmem:[#allocation2 + $0x4f4] ss:$8 sps:$4 sm:$0xff]  }
 0x1aa   :  { %1051 = vmatprep.subr.bf16.mxu0 %v1876_v11  ;;  %v1948_v11 = vld [vmem:[#allocation2 + $0x4e4] ss:$8 sps:$4 sm:$0xff]  }
 0x1ad   :  { %1052 = vmatpush1.bf16.msra.mxu0 %v1874_v12  ;;  %v1946_v12 = vld [vmem:[#allocation2 + $0x4e0] ss:$8 sps:$4 sm:$0xff]  }
 0x1ae   :  { %1053 = vmatprep.subr.bf16.mxu0 %v1879_v13  ;;  %v1951_v13 = vld [vmem:[#allocation2 + $0x4d4] ss:$8 sps:$4 sm:$0xff]  }
 0x1b1   :  { %1054 = vmatpush1.bf16.msra.mxu0 %v1877_v14  ;;  %v1949_v14 = vld [vmem:[#allocation2 + $0x4d0] ss:$8 sps:$4 sm:$0xff]  }
 0x1b2   :  { %1055 = vmatprep.subr.bf16.mxu0 %v1882_v15  ;;  %v1954_v15 = vld [vmem:[#allocation2 + $0x4c4] ss:$8 sps:$4 sm:$0xff]  }
 0x1b5   :  { %1056 = vmatpush1.bf16.msra.mxu0 %v1880_v16  ;;  %v1952_v16 = vld [vmem:[#allocation2 + $0x4c0] ss:$8 sps:$4 sm:$0xff]  }
 0x1b6   :  { %1057 = vmatprep.subr.bf16.mxu0 %v1885_v17  ;;  %v1957_v17 = vld [vmem:[#allocation2 + $0x4b4] ss:$8 sps:$4 sm:$0xff]  }
 0x1b9   :  { %1058 = vmatpush1.bf16.msra.mxu0 %v1883_v18  ;;  %v1955_v18 = vld [vmem:[#allocation2 + $0x4b0] ss:$8 sps:$4 sm:$0xff]  }
 0x1ba   :  { %1059 = vmatprep.subr.bf16.mxu0 %v1888_v19  ;;  %v1960_v19 = vld [vmem:[#allocation2 + $0x4a4] ss:$8 sps:$4 sm:$0xff]  }
 0x1bd   :  { %1060 = vmatpush1.bf16.msra.mxu0 %v1886_v20  ;;  %v1958_v20 = vld [vmem:[#allocation2 + $0x4a0] ss:$8 sps:$4 sm:$0xff]  }
 0x1be   :  { %1061 = vmatprep.subr.bf16.mxu0 %v1891_v21  ;;  %v637_v21 = vsub.s32 3, %v2048_v5 }
 0x1c1   :  { %1062 = vmatpush1.bf16.msra.mxu0 %v1889_v22  ;;  %v638_v22 = vrot.slane %v2054_v7, %v637_v21 }
 0x1c2   :  { %1063 = vmatprep.subr.bf16.mxu0 %v1894_v23  ;;  %v642_v23 = vrot.slane %v2059_v8, %v637_v21 }
 0x1c5   :  { %1064 = vmatpush1.bf16.msra.mxu0 %v1892_v24 }
 0x1c6   :  { %1065 = vmatprep.subr.bf16.mxu0 %v1897_v25 }
 0x1c9   :  { %1066 = vmatpush2.bf16.msra.mxu0 %v1895_v26 }
 0x1ca   :  { %1067 = vmatprep.subr.bf16.mxu0 %v1900_v27 }
 0x1cd   :  { %1068 = vmatpush2.bf16.msra.mxu0 %v1898_v28 }
 0x1ce   :  { %1069 = vmatprep.subr.bf16.mxu0 %v1903_v29 }
 0x1d1   :  { %1070 = vmatpush2.bf16.msra.mxu0 %v1901_v30 }
 0x1d2   :  { %1071 = vmatprep.subr.bf16.mxu0 %v1906_v31 }
 0x1d5   :  { %1072 = vmatpush2.bf16.msra.mxu0 %v1904_v32 }
 0x1d6   :  { %1073 = vmatprep.subr.bf16.mxu0 %v1909_v33 }
 0x1d9   :  { %1074 = vmatpush2.bf16.msra.mxu0 %v1907_v34  ;;  %v1963_v34 = vld [vmem:[#allocation2 + $0x494] ss:$8 sps:$4 sm:$0xff]  }
 0x1da   :  { %1075 = vmatprep.subr.bf16.mxu0 %v1912_v35  ;;  %v1961_v35 = vld [vmem:[#allocation2 + $0x490] ss:$8 sps:$4 sm:$0xff]  }
 0x1dd   :  { %1076 = vmatpush2.bf16.msra.mxu0 %v1910_v36  ;;  %v1966_v36 = vld [vmem:[#allocation2 + $0x484] ss:$8 sps:$4 sm:$0xff]  }
 0x1de   :  { %1077 = vmatprep.subr.bf16.mxu0 %v1915_v50  ;;  %v883_v50 = vsub.s32 4, %v2048_v5 }
 0x1e1   :  { %1078 = vmatpush2.bf16.msra.mxu0 %v1913_v51  ;;  %v884_v51 = vrot.slane %v2054_v7, %v883_v50 }
 0x1e2   :  { %1079 = vmatprep.subr.bf16.mxu0 %v1918_v52  ;;  %v888_v52 = vrot.slane %v2059_v8, %v883_v50 }
 0x1e5   :  { %1080 = vmatpush2.bf16.msra.mxu0 %v1916_v53 }
 0x268   :  { %v591_v40 = vpop.f32.mrf.mxu0 }
 0x269   :  { %v592_v41 = vadd.f32 %v591_v40, %v392_v38  ;;  %v1967_v38 = vld [vmem:[%s2135_s4 + $0x78] sm:$0xff]   ;;  %v1969_v40 = vld [vmem:[%s2135_s4 + $0x70] sm:$0xff]  }
 0x26a   :  { %v593_v42 = vpop.f32.mrf.mxu0  ;;  %1699 = vmatprep.subr.bf16.mxu0 %v1967_v38 }
 0x26b   :  { %v594_v43 = vadd.f32 %v593_v42, %v396_v39  ;;  %v598_v44 = vmax.f32 %v592_v41, 0.0  ;;  %v1968_v39 = vld [vmem:[%s2135_s4 + $0x38] sm:$0xff]   ;;  %v1970_v41 = vld [vmem:[%s2135_s4 + $0x30] sm:$0xff]   ;;  %v1971_v42 = vld [vmem:[%s2135_s4 + $0x68] sm:$0xff]  }
 0x26c   :  { %v595_v45 = vpop.f32.mrf.mxu0 }
 0x26d   :  { %v599_v46 = vmax.f32 %v594_v43, 0.0  ;;  %v600_v49 = vpack.c.bf16 %v598_v44, %v598_v44  ;;  %v1972_v43 = vld [vmem:[%s2135_s4 + $0x28] sm:$0xff]   ;;  %v1973_v44 = vld [vmem:[%s2135_s4 + $0x60] sm:$0xff]  }
 0x26e   :  { %v596_v47 = vpop.f32.mrf.mxu0  ;;  %v1974_v45 = vld [vmem:[%s2135_s4 + $0x20] sm:$0xff]  }
 0x26f   :  { %v601_v48 = vpack.c.bf16 %v599_v46, %v599_v46  ;;  %v1975_v46 = vld [vmem:[%s2135_s4 + $0x58] sm:$0xff]  }
 0x270   :  { %v1976_v47 = vld [vmem:[%s2135_s4 + $0x18] sm:$0xff]  }
 0x271   :  { %835 = vmatprep.mubr.bf16.mxu1 %v601_v48  ;;  %v1977_v48 = vld [vmem:[%s2135_s4 + $0x50] sm:$0xff]  }
 0x272   :  { %836 = vmatmul.mubr.bf16.vlgmr.msra.gmra.mxu1 %v600_v49  ;;  %v1978_v49 = vld [vmem:[%s2135_s4 + $0x10] sm:$0xff]  }
 0x273   :  { %1296 = vmatpush1.bf16.msra.mxu1 %v1919_v54 }
 0x274   :  { %1297 = vmatprep.subr.bf16.mxu1 %v1924_v56 }
 0x277   :  { %1298 = vmatpush1.bf16.msra.mxu1 %v1922_v57 }
 0x278   :  { %1299 = vmatprep.subr.bf16.mxu1 %v1927_v58 }
 0x27b   :  { %1300 = vmatpush1.bf16.msra.mxu1 %v1925_v59 }
 0x27c   :  { %1301 = vmatprep.subr.bf16.mxu1 %v1930_v60 }
 0x27f   :  { %1302 = vmatpush1.bf16.msra.mxu1 %v1928_v61 }
 0x280   :  { %1303 = vmatprep.subr.bf16.mxu1 %v1933_v62 }
 0x283   :  { %1304 = vmatpush1.bf16.msra.mxu1 %v1931_v63  ;;  %v1979_v63 = vld [vmem:[%s2135_s4 + $0x48] sm:$0xff]  }
 0x284   :  { %1305 = vmatprep.subr.bf16.mxu1 %v1936_v0  ;;  %v1980_v0 = vld [vmem:[%s2135_s4 + $0x8] sm:$0xff]  }
 0x287   :  { %1306 = vmatpush1.bf16.msra.mxu1 %v1934_v1  ;;  %v1981_v1 = vld [vmem:[%s2135_s4 + $0x40] sm:$0xff]  }
 0x288   :  { %1307 = vmatprep.subr.bf16.mxu1 %v1939_v2  ;;  %v1982_v2 = vld [vmem:[%s2135_s4] sm:$0xff]  }
 0x28b   :  { %1308 = vmatpush1.bf16.msra.mxu1 %v1937_v3  ;;  %v1129_v3 = vsub.s32 5, %v2048_v5 }
 0x28c   :  { %1309 = vmatprep.subr.bf16.mxu1 %v1942_v4 }
 0x28d   :  { %v1130_v4 = vrot.slane %v2054_v7, %v1129_v3 }
 0x28f   :  { %1310 = vmatpush1.bf16.msra.mxu1 %v1940_v6  ;;  %v1134_v6 = vrot.slane %v2059_v8, %v1129_v3 }
 0x290   :  { %1311 = vmatprep.subr.bf16.mxu1 %v1945_v9 }
 0x293   :  { %1312 = vmatpush2.bf16.msra.mxu1 %v1943_v10 }
 0x294   :  { %1313 = vmatprep.subr.bf16.mxu1 %v1948_v11 }
 0x297   :  { %1314 = vmatpush2.bf16.msra.mxu1 %v1946_v12 }
 0x298   :  { %1315 = vmatprep.subr.bf16.mxu1 %v1951_v13 }
 0x29b   :  { %1316 = vmatpush2.bf16.msra.mxu1 %v1949_v14 }
 0x29c   :  { %1317 = vmatprep.subr.bf16.mxu1 %v1954_v15 }
 0x29f   :  { %1318 = vmatpush2.bf16.msra.mxu1 %v1952_v16 }
 0x2a0   :  { %1319 = vmatprep.subr.bf16.mxu1 %v1957_v17 }
 0x2a3   :  { %1320 = vmatpush2.bf16.msra.mxu1 %v1955_v18 }
 0x2a4   :  { %1321 = vmatprep.subr.bf16.mxu1 %v1960_v19  ;;  %v1374_v19 = vsub.s32 6, %v2048_v5 }
 0x2a6   :  { %v1375_v21 = vrot.slane %v2054_v7, %v1374_v19 }
 0x2a7   :  { %1322 = vmatpush2.bf16.msra.mxu1 %v1958_v20 }
 0x2a8   :  { %1323 = vmatprep.subr.bf16.mxu1 %v1963_v34 }
 0x2ab   :  { %1324 = vmatpush2.bf16.msra.mxu1 %v1961_v35 }
 0x2ac   :  { %1325 = vmatprep.subr.bf16.mxu1 %v1966_v36 }
 0x2af   :  { %1326 = vmatpush2.bf16.msra.mxu1 %v1964_v37 }
 0x332   :  { %v837_v24 = vpop.f32.mrf.mxu1 }
 0x333   :  { %v838_v25 = vadd.f32 %v837_v24, %v638_v22 }
 0x334   :  { %v839_v26 = vpop.f32.mrf.mxu1 }
 0x335   :  { %v840_v27 = vadd.f32 %v839_v26, %v642_v23  ;;  %v844_v28 = vmax.f32 %v838_v25, 0.0 }
 0x336   :  { %v841_v29 = vpop.f32.mrf.mxu1 }
 0x337   :  { %v845_v30 = vmax.f32 %v840_v27, 0.0  ;;  %v846_v33 = vpack.c.bf16 %v844_v28, %v844_v28 }
 0x338   :  { %v842_v31 = vpop.f32.mrf.mxu1 }
 0x339   :  { %v847_v32 = vpack.c.bf16 %v845_v30, %v845_v30 }
 0x33b   :  { %1081 = vmatprep.mubr.bf16.mxu0 %v847_v32 }
 0x33c   :  { %1082 = vmatmul.mubr.bf16.vlgmr.msra.gmra.mxu0 %v846_v33 }
 0x33d   :  { %1700 = vmatpush3.bf16.msra.mxu0 %v1968_v39 }
 0x33e   :  { %1701 = vmatprep.subr.bf16.mxu0 %v1969_v40 }
 0x341   :  { %1702 = vmatpush3.bf16.msra.mxu0 %v1970_v41 }
 0x342   :  { %1703 = vmatprep.subr.bf16.mxu0 %v1971_v42 }
 0x345   :  { %1704 = vmatpush3.bf16.msra.mxu0 %v1972_v43 }
 0x346   :  { %1705 = vmatprep.subr.bf16.mxu0 %v1973_v44 }
 0x349   :  { %1706 = vmatpush3.bf16.msra.mxu0 %v1974_v45 }
 0x34a   :  { %1707 = vmatprep.subr.bf16.mxu0 %v1975_v46 }
 0x34d   :  { %1708 = vmatpush3.bf16.msra.mxu0 %v1976_v47 }
 0x34e   :  { %1709 = vmatprep.subr.bf16.mxu0 %v1977_v48 }
 0x351   :  { %1710 = vmatpush3.bf16.msra.mxu0 %v1978_v49 }
 0x352   :  { %1711 = vmatprep.subr.bf16.mxu0 %v1979_v63 }
 0x355   :  { %1712 = vmatpush3.bf16.msra.mxu0 %v1980_v0 }
 0x356   :  { %1713 = vmatprep.subr.bf16.mxu0 %v1981_v1 }
 0x359   :  { %1714 = vmatpush3.bf16.msra.mxu0 %v1982_v2 }
 0x3fc   :  { %v1083_v53 = vpop.f32.mrf.mxu0 }
 0x3fd   :  { %v1084_v54 = vadd.f32 %v1083_v53, %v884_v51 }
 0x3fe   :  { %v1085_v55 = vpop.f32.mrf.mxu0 }
 0x3ff   :  { %v1086_v56 = vadd.f32 %v1085_v55, %v888_v52  ;;  %v1090_v57 = vmax.f32 %v1084_v54, 0.0 }
 0x400   :  { %v1087_v58 = vpop.f32.mrf.mxu0 }
 0x401   :  { %v1091_v59 = vmax.f32 %v1086_v56, 0.0  ;;  %v1092_v62 = vpack.c.bf16 %v1090_v57, %v1090_v57 }
 0x402   :  { %v1088_v60 = vpop.f32.mrf.mxu0 }
 0x403   :  { %v1093_v61 = vpack.c.bf16 %v1091_v59, %v1091_v59 }
 0x405   :  { %1327 = vmatprep.mubr.bf16.mxu1 %v1093_v61 }
 0x406   :  { %1328 = vmatmul.mubr.bf16.vlgmr.msra.gmra.mxu1 %v1092_v62 }
 0x4c6   :  { %v1329_v9 = vpop.f32.mrf.mxu1 }
 0x4c7   :  { %v1330_v10 = vadd.f32 %v1329_v9, %v1130_v4 }
 0x4c8   :  { %v1331_v11 = vpop.f32.mrf.mxu1 }
 0x4c9   :  { %v1332_v12 = vadd.f32 %v1331_v11, %v1134_v6  ;;  %v1336_v13 = vmax.f32 %v1330_v10, 0.0 }
 0x4ca   :  { %v1333_v14 = vpop.f32.mrf.mxu1 }
 0x4cb   :  { %v1337_v15 = vmax.f32 %v1332_v12, 0.0  ;;  %v1338_v18 = vpack.c.bf16 %v1336_v13, %v1336_v13 }
 0x4cc   :  { %v1334_v16 = vpop.f32.mrf.mxu1 }
 0x4cd   :  { %v1339_v17 = vpack.c.bf16 %v1337_v15, %v1337_v15 }
 0x4cf   :  { %1504 = vmatprep.mubr.bf16.mxu0 %v1339_v17 }
 0x4d0   :  { %1505 = vmatmul.mubr.bf16.vlgmr.msra.gmra.mxu0 %v1338_v18 }
 0x590   :  { %v1715_v20 = vpop.f32.mrf.mxu0 }
 0x592   :  { %v1716_v22 = vpop.f32.mrf.mxu0 }
 0x593   :  { %v1717_v23 = vadd.f32 %v1716_v22, %v1715_v20 }
 0x594   :  { %v1718_v8 = vpop.f32.mrf.mxu0 }
 0x595   :  { %v1507_v24 = vadd.f32 %v1717_v23, %v1375_v21 }
 0x596   :  { %v1719_v25 = vpop.f32.mrf.mxu0 }
 0x597   :  { %1513 = vst.msk [vmem:[%s2136_s5] sm:$0xff] %vm1512_vm3, %v1507_v24 }
 0x598   :  { %1518 = vsyncpa [#allocation3], 1 }

// kernel: tpu_custom_call.1
= control target key start
LH: loop header
LB: loop body
LE: loop exit
PB: predicated region body
PF: predicated region fallthrough
CT: control target
= control target key end

     0   :  { %10 = vsyncpa [#allocation3], 0  ;;  %s2005_s18 = smov [#allocation2]   ;;  %s2131_s0 = inlined_call_operand.vmem [shape: f32[8,6], index: 0, kind: input, shape index: {}]   ;;  %s2132_s1 = inlined_call_operand.vmem [shape: bf16[8,256], index: 1, kind: input, shape index: {}]   ;;  %s2133_s2 = inlined_call_operand.hbm [shape: bf16[5,256,256], index: 2, kind: input, shape index: {}]   ;;  %s2134_s3 = inlined_call_operand.vmem [shape: f32[7,256], index: 3, kind: input, shape index: {}]   ;;  %s2135_s4 = inlined_call_operand.vmem [shape: bf16[256,4], index: 4, kind: input, shape index: {}]   ;;  %s2136_s5 = inlined_call_operand.vmem [shape: f32[8,4], index: 5, kind: output, shape index: {}]  }
   0x1   :  { %s20_s19 = sshll.u32 %s2005_s18, 4  ;;  %s21_s19 = int_to_ptr.vmem [resolvable:$true] %s20_s19 }
   0x2   :  { %s1991_s20 = scalar_lea.vmem %s21_s19, 20480  ;;  %p1996_p1 = scmp.lt.s32.totalorder %s21_s19, %s21_s19 }
   0x3   :  { %p1992_p0 = scmp.ne.s32.totalorder %s21_s19, %s1991_s20  ;;  %p1997_p2 = scmp.lt.s32.totalorder %s1991_s20, %s1991_s20 }
   0x5   :  { %p1998_p3 = por %p1997_p2, %p1996_p1 }
   0x7   :  { %p1999_p4 = pnand %p1998_p3, %p1992_p0 }
   0x9   :  { %2002 = shalt.err (!%p1999_p4)
}
   0xa   :  { %s2006_s21 = smov 128   ;;  %s2007_s22 = smov 8  }
   0xb   :  { %26 = dma.hbm_to_vmem [thread:$0]  %s2133_s2, 20480, %s21_s19, [#allocation3], %s2006_s21, %s2006_s21, %s2007_s22  }
   0xc   :  { %2003 = dma.done.wait [#allocation3], 20480  }
   0xd   :  { %2004 = vsyncadd [#allocation3], 4294946816  ;;  %v2008_v0 = vmov 0   ;;  %vm38_vm0 = vcmask 48128   ;;  %v41_v1 = vld [vmem:[%s2132_s1] sm:$0xff]  ;;  %vm59_vm1 = vcmask 1043456  }
   0xe   :  { %98 = vmatprep.mubr.bf16.mxu0 %v2008_v0  ;;  %v37_v2 = vld [vmem:[%s2131_s0] sm:$0xff]  ;;  %v1520_v3 = vcombine.high %v41_v1, %v41_v1  ;;  %v1519_v4 = vcombine.low %v41_v1, %v41_v1  ;;  %v1727_v6 = vld [vmem:[#allocation2 + $0x74] ss:$8 sps:$4 sm:$0xff]   ;;  %v1729_v7 = vld [vmem:[#allocation2 + $0x70] ss:$8 sps:$4 sm:$0xff]   ;;  %vm55_vm2 = vcmask 64512  }
   0xf   :  { %v39_v5 = vsel %vm38_vm0, %v37_v2, 0.0  ;;  %v1730_v8 = vld [vmem:[#allocation2 + $0x64] ss:$8 sps:$4 sm:$0xff]   ;;  %311 = vmatprep.subr.bf16.mxu1 %v1727_v6  ;;  %v1732_v11 = vld [vmem:[#allocation2 + $0x60] ss:$8 sps:$4 sm:$0xff]   ;;  %vm1512_vm3 = vcmask 31744  }
  0x10   :  { %1521 = vmatprep.subr.msk.bf16.mxu0 %vm59_vm1, %v1520_v3  ;;  %v61_v9 = vsel %vm59_vm1, %v1519_v4, 0  ;;  %v40_v10 = vpack.c.bf16 %v39_v5, %v39_v5  ;;  %312 = vmatpush1.bf16.msra.mxu1 %v1729_v7  ;;  %v1733_v12 = vld [vmem:[#allocation2 + $0x54] ss:$8 sps:$4 sm:$0xff]   ;;  %v1735_v13 = vld [vmem:[#allocation2 + $0x50] ss:$8 sps:$4 sm:$0xff]   ;;  %v42_v4 = vlaneseq }
  0x11   :  { %81 = vmatpush1.bf16.msra.mxu0 %v61_v9  ;;  %313 = vmatprep.subr.bf16.mxu1 %v1730_v8  ;;  %v1736_v14 = vld [vmem:[#allocation2 + $0x44] ss:$8 sps:$4 sm:$0xff]   ;;  %v1738_v15 = vld [vmem:[#allocation2 + $0x40] ss:$8 sps:$4 sm:$0xff]   ;;  %v1739_v16 = vld [vmem:[#allocation2 + $0x34] ss:$8 sps:$4 sm:$0xff]  }
  0x12   :  { %v1741_v17 = vld [vmem:[#allocation2 + $0x30] ss:$8 sps:$4 sm:$0xff]   ;;  %v1742_v18 = vld [vmem:[#allocation2 + $0x24] ss:$8 sps:$4 sm:$0xff]   ;;  %v1744_v19 = vld [vmem:[#allocation2 + $0x20] ss:$8 sps:$4 sm:$0xff]  }
  0x13   :  { %v1745_v20 = vld [vmem:[#allocation2 + $0x14] ss:$8 sps:$4 sm:$0xff]   ;;  %v1747_v21 = vld [vmem:[#allocation2 + $0x10] ss:$8 sps:$4 sm:$0xff]   ;;  %v1748_v22 = vld [vmem:[#allocation2 + $0x4] ss:$8 sps:$4 sm:$0xff]  }
  0x14   :  { %1522 = vmatmul.mubr.msk.bf16.vlgmr.msra.gmra.mxu0 %vm55_vm2, %v40_v10  ;;  %314 = vmatpush1.bf16.msra.mxu1 %v1732_v11  ;;  %v1750_v23 = vld [vmem:[#allocation2] ss:$8 sps:$4 sm:$0xff]   ;;  %v1751_v24 = vld [vmem:[#allocation2 + $0xf4] ss:$8 sps:$4 sm:$0xff]   ;;  %v1753_v25 = vld [vmem:[#allocation2 + $0xf0] ss:$8 sps:$4 sm:$0xff]  }
  0x15   :  { %315 = vmatprep.subr.bf16.mxu1 %v1733_v12  ;;  %v1754_v26 = vld [vmem:[#allocation2 + $0xe4] ss:$8 sps:$4 sm:$0xff]   ;;  %v1756_v27 = vld [vmem:[#allocation2 + $0xe0] ss:$8 sps:$4 sm:$0xff]   ;;  %v1757_v28 = vld [vmem:[#allocation2 + $0xd4] ss:$8 sps:$4 sm:$0xff]  }
  0x16   :  { %v1759_v29 = vld [vmem:[#allocation2 + $0xd0] ss:$8 sps:$4 sm:$0xff]   ;;  %v1760_v30 = vld [vmem:[#allocation2 + $0xc4] ss:$8 sps:$4 sm:$0xff]   ;;  %v1762_v31 = vld [vmem:[#allocation2 + $0xc0] ss:$8 sps:$4 sm:$0xff]  }
  0x17   :  { %v1763_v32 = vld [vmem:[#allocation2 + $0xb4] ss:$8 sps:$4 sm:$0xff]   ;;  %v1765_v33 = vld [vmem:[#allocation2 + $0xb0] ss:$8 sps:$4 sm:$0xff]   ;;  %v1766_v34 = vld [vmem:[#allocation2 + $0xa4] ss:$8 sps:$4 sm:$0xff]  }
  0x18   :  { %316 = vmatpush1.bf16.msra.mxu1 %v1735_v13  ;;  %v1768_v35 = vld [vmem:[#allocation2 + $0xa0] ss:$8 sps:$4 sm:$0xff]   ;;  %v1769_v36 = vld [vmem:[#allocation2 + $0x94] ss:$8 sps:$4 sm:$0xff]   ;;  %v1771_v37 = vld [vmem:[#allocation2 + $0x90] ss:$8 sps:$4 sm:$0xff]  }
  0x19   :  { %317 = vmatprep.subr.bf16.mxu1 %v1736_v14  ;;  %v1772_v38 = vld [vmem:[#allocation2 + $0x84] ss:$8 sps:$4 sm:$0xff]   ;;  %v1774_v39 = vld [vmem:[#allocation2 + $0x80] ss:$8 sps:$4 sm:$0xff]   ;;  %v1775_v40 = vld [vmem:[#allocation2 + $0x170] ss:$8 sps:$4 sm:$0xff]  }
  0x1a   :  { %v1777_v41 = vld [vmem:[#allocation2 + $0x174] ss:$8 sps:$4 sm:$0xff]   ;;  %v1780_v42 = vld [vmem:[#allocation2 + $0x164] ss:$8 sps:$4 sm:$0xff]   ;;  %v1778_v43 = vld [vmem:[#allocation2 + $0x160] ss:$8 sps:$4 sm:$0xff]  }
  0x1b   :  { %557 = vmatprep.subr.bf16.mxu0 %v1777_v41  ;;  %v1783_v44 = vld [vmem:[#allocation2 + $0x154] ss:$8 sps:$4 sm:$0xff]   ;;  %v1781_v45 = vld [vmem:[#allocation2 + $0x150] ss:$8 sps:$4 sm:$0xff]   ;;  %v1786_v46 = vld [vmem:[#allocation2 + $0x144] ss:$8 sps:$4 sm:$0xff]  }
  0x1c   :  { %318 = vmatpush1.bf16.msra.mxu1 %v1738_v15  ;;  %558 = vmatpush1.bf16.msra.mxu0 %v1775_v40  ;;  %v1784_v47 = vld [vmem:[#allocation2 + $0x140] ss:$8 sps:$4 sm:$0xff]   ;;  %v1789_v48 = vld [vmem:[#allocation2 + $0x134] ss:$8 sps:$4 sm:$0xff]   ;;  %v1787_v49 = vld [vmem:[#allocation2 + $0x130] ss:$8 sps:$4 sm:$0xff]  }
  0x1d   :  { %319 = vmatprep.subr.bf16.mxu1 %v1739_v16  ;;  %559 = vmatprep.subr.bf16.mxu0 %v1780_v42  ;;  %v1792_v50 = vld [vmem:[#allocation2 + $0x124] ss:$8 sps:$4 sm:$0xff]   ;;  %v1790_v51 = vld [vmem:[#allocation2 + $0x120] ss:$8 sps:$4 sm:$0xff]   ;;  %v1795_v52 = vld [vmem:[#allocation2 + $0x114] ss:$8 sps:$4 sm:$0xff]  }
  0x1e   :  { %v1793_v53 = vld [vmem:[#allocation2 + $0x110] ss:$8 sps:$4 sm:$0xff]   ;;  %v1798_v54 = vld [vmem:[#allocation2 + $0x104] ss:$8 sps:$4 sm:$0xff]   ;;  %v1796_v55 = vld [vmem:[#allocation2 + $0x100] ss:$8 sps:$4 sm:$0xff]  }
  0x1f   :  { %v1801_v56 = vld [vmem:[#allocation2 + $0x1f4] ss:$8 sps:$4 sm:$0xff]   ;;  %v1799_v57 = vld [vmem:[#allocation2 + $0x1f0] ss:$8 sps:$4 sm:$0xff]   ;;  %v1804_v58 = vld [vmem:[#allocation2 + $0x1e4] ss:$8 sps:$4 sm:$0xff]  }
  0x20   :  { %320 = vmatpush1.bf16.msra.mxu1 %v1741_v17  ;;  %560 = vmatpush1.bf16.msra.mxu0 %v1778_v43  ;;  %v1802_v59 = vld [vmem:[#allocation2 + $0x1e0] ss:$8 sps:$4 sm:$0xff]   ;;  %v1807_v60 = vld [vmem:[#allocation2 + $0x1d4] ss:$8 sps:$4 sm:$0xff]   ;;  %v1805_v61 = vld [vmem:[#allocation2 + $0x1d0] ss:$8 sps:$4 sm:$0xff]  }
  0x21   :  { %321 = vmatprep.subr.bf16.mxu1 %v1742_v18  ;;  %561 = vmatprep.subr.bf16.mxu0 %v1783_v44  ;;  %v1810_v62 = vld [vmem:[#allocation2 + $0x1c4] ss:$8 sps:$4 sm:$0xff]   ;;  %v1808_v63 = vld [vmem:[#allocation2 + $0x1c0] ss:$8 sps:$4 sm:$0xff]   ;;  %v1813_v0 = vld [vmem:[#allocation2 + $0x1b4] ss:$8 sps:$4 sm:$0xff]  }
  0x22   :  { %v1811_v1 = vld [vmem:[#allocation2 + $0x1b0] ss:$8 sps:$4 sm:$0xff]   ;;  %v1816_v2 = vld [vmem:[#allocation2 + $0x1a4] ss:$8 sps:$4 sm:$0xff]   ;;  %v1814_v3 = vld [vmem:[#allocation2 + $0x1a0] ss:$8 sps:$4 sm:$0xff]  }
  0x23   :  { %v2048_v5 = vshrl.u32 %v42_v4, 7  ;;  %v2054_v7 = vld [vmem:[%s2134_s3] sm:$0x7f]  ;;  %v2059_v8 = vld [vmem:[%s2134_s3 + $0x8] sm:$0x7f] }
  0x24   :  { %322 = vmatpush1.bf16.msra.mxu1 %v1744_v19  ;;  %562 = vmatpush1.bf16.msra.mxu0 %v1781_v45  ;;  %v1844_v40 = vld [vmem:[#allocation2 + $0x200] ss:$8 sps:$4 sm:$0xff]   ;;  %v1849_v41 = vld [vmem:[#allocation2 + $0x2f4] ss:$8 sps:$4 sm:$0xff]   ;;  %v1847_v42 = vld [vmem:[#allocation2 + $0x2f0] ss:$8 sps:$4 sm:$0xff]  }
  0x25   :  { %323 = vmatprep.subr.bf16.mxu1 %v1745_v20  ;;  %563 = vmatprep.subr.bf16.mxu0 %v1786_v46  ;;  %v44_v6 = vsub.s32 0, %v2048_v5  ;;  %v1852_v43 = vld [vmem:[#allocation2 + $0x2e4] ss:$8 sps:$4 sm:$0xff]   ;;  %v1850_v44 = vld [vmem:[#allocation2 + $0x2e0] ss:$8 sps:$4 sm:$0xff]  }
  0x26   :  { %v1855_v45 = vld [vmem:[#allocation2 + $0x2d4] ss:$8 sps:$4 sm:$0xff]   ;;  %v1853_v46 = vld [vmem:[#allocation2 + $0x2d0] ss:$8 sps:$4 sm:$0xff]   ;;  %v1870_v4 = vld [vmem:[#allocation2 + $0x284] ss:$8 sps:$4 sm:$0xff]  }
  0x27   :  { %v45_v9 = vrot.slane %v2054_v7, %v44_v6  ;;  %v49_v10 = vrot.slane %v2059_v8, %v44_v6  ;;  %v1868_v6 = vld [vmem:[#allocation2 + $0x280] ss:$8 sps:$4 sm:$0xff]  }
  0x28   :  { %324 = vmatpush1.bf16.msra.mxu1 %v1747_v21  ;;  %564 = vmatpush1.bf16.msra.mxu0 %v1784_v47  ;;  %v1819_v21 = vld [vmem:[#allocation2 + $0x194] ss:$8 sps:$4 sm:$0xff]   ;;  %v1858_v47 = vld [vmem:[#allocation2 + $0x2c4] ss:$8 sps:$4 sm:$0xff]  }
  0x29   :  { %325 = vmatprep.subr.bf16.mxu1 %v1748_v22  ;;  %565 = vmatprep.subr.bf16.mxu0 %v1789_v48  ;;  %v1817_v22 = vld [vmem:[#allocation2 + $0x190] ss:$8 sps:$4 sm:$0xff]   ;;  %v1856_v48 = vld [vmem:[#allocation2 + $0x2c0] ss:$8 sps:$4 sm:$0xff]  }
  0x2c   :  { %326 = vmatpush1.bf16.msra.mxu1 %v1750_v23  ;;  %566 = vmatpush1.bf16.msra.mxu0 %v1787_v49  ;;  %v1822_v23 = vld [vmem:[#allocation2 + $0x184] ss:$8 sps:$4 sm:$0xff]   ;;  %v1861_v49 = vld [vmem:[#allocation2 + $0x2b4] ss:$8 sps:$4 sm:$0xff]  }
  0x2d   :  { %327 = vmatprep.subr.bf16.mxu1 %v1751_v24  ;;  %567 = vmatprep.subr.bf16.mxu0 %v1792_v50  ;;  %v1820_v24 = vld [vmem:[#allocation2 + $0x180] ss:$8 sps:$4 sm:$0xff]   ;;  %v1859_v50 = vld [vmem:[#allocation2 + $0x2b0] ss:$8 sps:$4 sm:$0xff]  }
  0x30   :  { %328 = vmatpush2.bf16.msra.mxu1 %v1753_v25  ;;  %568 = vmatpush1.bf16.msra.mxu0 %v1790_v51  ;;  %v1823_v25 = vld [vmem:[#allocation2 + $0x270] ss:$8 sps:$4 sm:$0xff]   ;;  %v1864_v51 = vld [vmem:[#allocation2 + $0x2a4] ss:$8 sps:$4 sm:$0xff]  }
  0x31   :  { %329 = vmatprep.subr.bf16.mxu1 %v1754_v26  ;;  %569 = vmatprep.subr.bf16.mxu0 %v1795_v52  ;;  %v1825_v26 = vld [vmem:[#allocation2 + $0x274] ss:$8 sps:$4 sm:$0xff]   ;;  %v1862_v52 = vld [vmem:[#allocation2 + $0x2a0] ss:$8 sps:$4 sm:$0xff]  }
  0x34   :  { %330 = vmatpush2.bf16.msra.mxu1 %v1756_v27  ;;  %570 = vmatpush1.bf16.msra.mxu0 %v1793_v53  ;;  %v1828_v27 = vld [vmem:[#allocation2 + $0x264] ss:$8 sps:$4 sm:$0xff]   ;;  %v145_v53 = vsub.s32 1, %v2048_v5 }
  0x35   :  { %331 = vmatprep.subr.bf16.mxu1 %v1757_v28  ;;  %571 = vmatprep.subr.bf16.mxu0 %v1798_v54  ;;  %v1826_v28 = vld [vmem:[#allocation2 + $0x260] ss:$8 sps:$4 sm:$0xff]  }
  0x36   :  { %v146_v54 = vrot.slane %v2054_v7, %v145_v53 }
  0x38   :  { %332 = vmatpush2.bf16.msra.mxu1 %v1759_v29  ;;  %572 = vmatpush1.bf16.msra.mxu0 %v1796_v55  ;;  %v1831_v29 = vld [vmem:[#allocation2 + $0x254] ss:$8 sps:$4 sm:$0xff]   ;;  %v150_v55 = vrot.slane %v2059_v8, %v145_v53  ;;  %v1916_v53 = vld [vmem:[#allocation2 + $0x380] ss:$8 sps:$4 sm:$0xff]  }
  0x39   :  { %333 = vmatprep.subr.bf16.mxu1 %v1760_v30  ;;  %573 = vmatprep.subr.bf16.mxu0 %v1801_v56  ;;  %v1829_v30 = vld [vmem:[#allocation2 + $0x250] ss:$8 sps:$4 sm:$0xff]  }
  0x3c   :  { %334 = vmatpush2.bf16.msra.mxu1 %v1762_v31  ;;  %574 = vmatpush2.bf16.msra.mxu0 %v1799_v57  ;;  %v1834_v31 = vld [vmem:[#allocation2 + $0x244] ss:$8 sps:$4 sm:$0xff]  }
  0x3d   :  { %335 = vmatprep.subr.bf16.mxu1 %v1763_v32  ;;  %575 = vmatprep.subr.bf16.mxu0 %v1804_v58  ;;  %v1832_v32 = vld [vmem:[#allocation2 + $0x240] ss:$8 sps:$4 sm:$0xff]  }
  0x40   :  { %336 = vmatpush2.bf16.msra.mxu1 %v1765_v33  ;;  %576 = vmatpush2.bf16.msra.mxu0 %v1802_v59  ;;  %v1837_v33 = vld [vmem:[#allocation2 + $0x234] ss:$8 sps:$4 sm:$0xff]  }
  0x41   :  { %337 = vmatprep.subr.bf16.mxu1 %v1766_v34  ;;  %577 = vmatprep.subr.bf16.mxu0 %v1807_v60  ;;  %v1835_v34 = vld [vmem:[#allocation2 + $0x230] ss:$8 sps:$4 sm:$0xff]  }
  0x44   :  { %338 = vmatpush2.bf16.msra.mxu1 %v1768_v35  ;;  %578 = vmatpush2.bf16.msra.mxu0 %v1805_v61  ;;  %v1840_v35 = vld [vmem:[#allocation2 + $0x224] ss:$8 sps:$4 sm:$0xff]  }
  0x45   :  { %339 = vmatprep.subr.bf16.mxu1 %v1769_v36  ;;  %579 = vmatprep.subr.bf16.mxu0 %v1810_v62  ;;  %v1838_v36 = vld [vmem:[#allocation2 + $0x220] ss:$8 sps:$4 sm:$0xff]  }
  0x48   :  { %340 = vmatpush2.bf16.msra.mxu1 %v1771_v37  ;;  %580 = vmatpush2.bf16.msra.mxu0 %v1808_v63  ;;  %v1843_v37 = vld [vmem:[#allocation2 + $0x214] ss:$8 sps:$4 sm:$0xff]  }
  0x49   :  { %341 = vmatprep.subr.bf16.mxu1 %v1772_v38  ;;  %581 = vmatprep.subr.bf16.mxu0 %v1813_v0  ;;  %v1841_v38 = vld [vmem:[#allocation2 + $0x210] ss:$8 sps:$4 sm:$0xff]  }
  0x4c   :  { %342 = vmatpush2.bf16.msra.mxu1 %v1774_v39  ;;  %582 = vmatpush2.bf16.msra.mxu0 %v1811_v1  ;;  %v1846_v39 = vld [vmem:[#allocation2 + $0x204] ss:$8 sps:$4 sm:$0xff]  }
  0x4d   :  { %583 = vmatprep.subr.bf16.mxu0 %v1816_v2  ;;  %803 = vmatprep.subr.bf16.mxu1 %v1825_v26  ;;  %v1867_v2 = vld [vmem:[#allocation2 + $0x294] ss:$8 sps:$4 sm:$0xff]   ;;  %v1895_v26 = vld [vmem:[#allocation2 + $0x3f0] ss:$8 sps:$4 sm:$0xff]  }
  0x50   :  { %584 = vmatpush2.bf16.msra.mxu0 %v1814_v3  ;;  %v1865_v3 = vld [vmem:[#allocation2 + $0x290] ss:$8 sps:$4 sm:$0xff]  }
  0x51   :  { %585 = vmatprep.subr.bf16.mxu0 %v1819_v21  ;;  %v1891_v21 = vld [vmem:[#allocation2 + $0x314] ss:$8 sps:$4 sm:$0xff]  }
  0x54   :  { %586 = vmatpush2.bf16.msra.mxu0 %v1817_v22  ;;  %v1889_v22 = vld [vmem:[#allocation2 + $0x310] ss:$8 sps:$4 sm:$0xff]  }
  0x55   :  { %587 = vmatprep.subr.bf16.mxu0 %v1822_v23  ;;  %v1894_v23 = vld [vmem:[#allocation2 + $0x304] ss:$8 sps:$4 sm:$0xff]  }
  0x58   :  { %588 = vmatpush2.bf16.msra.mxu0 %v1820_v24  ;;  %v1892_v24 = vld [vmem:[#allocation2 + $0x300] ss:$8 sps:$4 sm:$0xff]  }
  0xd4   :  { %v100_v11 = vpop.f32.mrf.mxu0 }
  0xd5   :  { %v101_v12 = vadd.f32 %v100_v11, %v45_v9  ;;  %v1871_v9 = vld [vmem:[#allocation2 + $0x370] ss:$8 sps:$4 sm:$0xff]   ;;  %v1876_v11 = vld [vmem:[#allocation2 + $0x364] ss:$8 sps:$4 sm:$0xff]  }
  0xd6   :  { %v102_v13 = vpop.f32.mrf.mxu0 }
  0xd7   :  { %v103_v14 = vadd.f32 %v102_v13, %v49_v10  ;;  %v107_v15 = vmax.f32 %v101_v12, 0.0  ;;  %v1873_v10 = vld [vmem:[#allocation2 + $0x374] ss:$8 sps:$4 sm:$0xff]   ;;  %v1874_v12 = vld [vmem:[#allocation2 + $0x360] ss:$8 sps:$4 sm:$0xff]  }
  0xd8   :  { %v104_v16 = vpop.f32.mrf.mxu0  ;;  %1049 = vmatprep.subr.bf16.mxu0 %v1873_v10  ;;  %v1879_v13 = vld [vmem:[#allocation2 + $0x354] ss:$8 sps:$4 sm:$0xff]   ;;  %v1943_v10 = vld [vmem:[#allocation2 + $0x4f0] ss:$8 sps:$4 sm:$0xff]  }
  0xd9   :  { %v108_v17 = vmax.f32 %v103_v14, 0.0  ;;  %v109_v20 = vpack.c.bf16 %v107_v15, %v107_v15  ;;  %v1877_v14 = vld [vmem:[#allocation2 + $0x350] ss:$8 sps:$4 sm:$0xff]   ;;  %v1882_v15 = vld [vmem:[#allocation2 + $0x344] ss:$8 sps:$4 sm:$0xff]  }
  0xda   :  { %v105_v18 = vpop.f32.mrf.mxu0  ;;  %v1880_v16 = vld [vmem:[#allocation2 + $0x340] ss:$8 sps:$4 sm:$0xff]  }
  0xdb   :  { %v110_v19 = vpack.c.bf16 %v108_v17, %v108_v17  ;;  %v1885_v17 = vld [vmem:[#allocation2 + $0x334] ss:$8 sps:$4 sm:$0xff]   ;;  %v1883_v18 = vld [vmem:[#allocation2 + $0x330] ss:$8 sps:$4 sm:$0xff]  }
  0xdd   :  { %343 = vmatprep.mubr.bf16.mxu1 %v110_v19  ;;  %v1888_v19 = vld [vmem:[#allocation2 + $0x324] ss:$8 sps:$4 sm:$0xff]  }
  0xde   :  { %344 = vmatmul.mubr.bf16.vlgmr.msra.gmra.mxu1 %v109_v20  ;;  %v1886_v20 = vld [vmem:[#allocation2 + $0x320] ss:$8 sps:$4 sm:$0xff]  }
  0xdf   :  { %804 = vmatpush1.bf16.msra.mxu1 %v1823_v25  ;;  %v1897_v25 = vld [vmem:[#allocation2 + $0x3f4] ss:$8 sps:$4 sm:$0xff]  }
  0xe0   :  { %805 = vmatprep.subr.bf16.mxu1 %v1828_v27  ;;  %v1900_v27 = vld [vmem:[#allocation2 + $0x3e4] ss:$8 sps:$4 sm:$0xff]  }
  0xe3   :  { %806 = vmatpush1.bf16.msra.mxu1 %v1826_v28  ;;  %v1898_v28 = vld [vmem:[#allocation2 + $0x3e0] ss:$8 sps:$4 sm:$0xff]  }
  0xe4   :  { %807 = vmatprep.subr.bf16.mxu1 %v1831_v29  ;;  %v1903_v29 = vld [vmem:[#allocation2 + $0x3d4] ss:$8 sps:$4 sm:$0xff]  }
  0xe7   :  { %808 = vmatpush1.bf16.msra.mxu1 %v1829_v30  ;;  %v1901_v30 = vld [vmem:[#allocation2 + $0x3d0] ss:$8 sps:$4 sm:$0xff]  }
  0xe8   :  { %809 = vmatprep.subr.bf16.mxu1 %v1834_v31  ;;  %v1906_v31 = vld [vmem:[#allocation2 + $0x3c4] ss:$8 sps:$4 sm:$0xff]  }
  0xeb   :  { %810 = vmatpush1.bf16.msra.mxu1 %v1832_v32  ;;  %v1904_v32 = vld [vmem:[#allocation2 + $0x3c0] ss:$8 sps:$4 sm:$0xff]  }
  0xec   :  { %811 = vmatprep.subr.bf16.mxu1 %v1837_v33  ;;  %v1909_v33 = vld [vmem:[#allocation2 + $0x3b4] ss:$8 sps:$4 sm:$0xff]  }
  0xef   :  { %812 = vmatpush1.bf16.msra.mxu1 %v1835_v34  ;;  %v1907_v34 = vld [vmem:[#allocation2 + $0x3b0] ss:$8 sps:$4 sm:$0xff]  }
  0xf0   :  { %813 = vmatprep.subr.bf16.mxu1 %v1840_v35  ;;  %v1912_v35 = vld [vmem:[#allocation2 + $0x3a4] ss:$8 sps:$4 sm:$0xff]  }
  0xf3   :  { %814 = vmatpush1.bf16.msra.mxu1 %v1838_v36  ;;  %v1910_v36 = vld [vmem:[#allocation2 + $0x3a0] ss:$8 sps:$4 sm:$0xff]  }
  0xf4   :  { %815 = vmatprep.subr.bf16.mxu1 %v1843_v37  ;;  %v391_v37 = vsub.s32 2, %v2048_v5 }
  0xf7   :  { %816 = vmatpush1.bf16.msra.mxu1 %v1841_v38  ;;  %v392_v38 = vrot.slane %v2054_v7, %v391_v37 }
  0xf8   :  { %817 = vmatprep.subr.bf16.mxu1 %v1846_v39  ;;  %v396_v39 = vrot.slane %v2059_v8, %v391_v37  ;;  %v1964_v37 = vld [vmem:[#allocation2 + $0x480] ss:$8 sps:$4 sm:$0xff]  }
  0xfb   :  { %818 = vmatpush1.bf16.msra.mxu1 %v1844_v40 }
  0xfc   :  { %819 = vmatprep.subr.bf16.mxu1 %v1849_v41 }
  0xff   :  { %820 = vmatpush2.bf16.msra.mxu1 %v1847_v42 }
 0x100   :  { %821 = vmatprep.subr.bf16.mxu1 %v1852_v43 }
 0x103   :  { %822 = vmatpush2.bf16.msra.mxu1 %v1850_v44 }
 0x104   :  { %823 = vmatprep.subr.bf16.mxu1 %v1855_v45 }
 0x107   :  { %824 = vmatpush2.bf16.msra.mxu1 %v1853_v46 }
 0x108   :  { %825 = vmatprep.subr.bf16.mxu1 %v1858_v47 }
 0x10b   :  { %826 = vmatpush2.bf16.msra.mxu1 %v1856_v48 }
 0x10c   :  { %827 = vmatprep.subr.bf16.mxu1 %v1861_v49 }
 0x10f   :  { %828 = vmatpush2.bf16.msra.mxu1 %v1859_v50  ;;  %v1915_v50 = vld [vmem:[#allocation2 + $0x394] ss:$8 sps:$4 sm:$0xff]  }
 0x110   :  { %829 = vmatprep.subr.bf16.mxu1 %v1864_v51  ;;  %v1913_v51 = vld [vmem:[#allocation2 + $0x390] ss:$8 sps:$4 sm:$0xff]  }
 0x113   :  { %830 = vmatpush2.bf16.msra.mxu1 %v1862_v52  ;;  %v1918_v52 = vld [vmem:[#allocation2 + $0x384] ss:$8 sps:$4 sm:$0xff]  }
 0x114   :  { %831 = vmatprep.subr.bf16.mxu1 %v1867_v2  ;;  %v1939_v2 = vld [vmem:[#allocation2 + $0x414] ss:$8 sps:$4 sm:$0xff]  }
 0x117   :  { %832 = vmatpush2.bf16.msra.mxu1 %v1865_v3  ;;  %v1937_v3 = vld [vmem:[#allocation2 + $0x410] ss:$8 sps:$4 sm:$0xff]  }
 0x118   :  { %833 = vmatprep.subr.bf16.mxu1 %v1870_v4  ;;  %v1942_v4 = vld [vmem:[#allocation2 + $0x404] ss:$8 sps:$4 sm:$0xff]  }
 0x11b   :  { %834 = vmatpush2.bf16.msra.mxu1 %v1868_v6  ;;  %v1940_v6 = vld [vmem:[#allocation2 + $0x400] ss:$8 sps:$4 sm:$0xff]  }
 0x19e   :  { %v345_v56 = vpop.f32.mrf.mxu1 }
 0x19f   :  { %v346_v57 = vadd.f32 %v345_v56, %v146_v54  ;;  %v1919_v54 = vld [vmem:[#allocation2 + $0x470] ss:$8 sps:$4 sm:$0xff]   ;;  %v1924_v56 = vld [vmem:[#allocation2 + $0x464] ss:$8 sps:$4 sm:$0xff]  }
 0x1a0   :  { %v347_v58 = vpop.f32.mrf.mxu1 }
 0x1a1   :  { %v348_v59 = vadd.f32 %v347_v58, %v150_v55  ;;  %v352_v60 = vmax.f32 %v346_v57, 0.0  ;;  %v1921_v55 = vld [vmem:[#allocation2 + $0x474] ss:$8 sps:$4 sm:$0xff]   ;;  %v1922_v57 = vld [vmem:[#allocation2 + $0x460] ss:$8 sps:$4 sm:$0xff]  }
 0x1a2   :  { %v349_v61 = vpop.f32.mrf.mxu1  ;;  %1295 = vmatprep.subr.bf16.mxu1 %v1921_v55  ;;  %v1927_v58 = vld [vmem:[#allocation2 + $0x454] ss:$8 sps:$4 sm:$0xff]  }
 0x1a3   :  { %v353_v62 = vmax.f32 %v348_v59, 0.0  ;;  %v354_v1 = vpack.c.bf16 %v352_v60, %v352_v60  ;;  %v1925_v59 = vld [vmem:[#allocation2 + $0x450] ss:$8 sps:$4 sm:$0xff]   ;;  %v1930_v60 = vld [vmem:[#allocation2 + $0x444] ss:$8 sps:$4 sm:$0xff]  }
 0x1a4   :  { %v350_v63 = vpop.f32.mrf.mxu1  ;;  %v1928_v61 = vld [vmem:[#allocation2 + $0x440] ss:$8 sps:$4 sm:$0xff]  }
 0x1a5   :  { %v355_v0 = vpack.c.bf16 %v353_v62, %v353_v62  ;;  %v1933_v62 = vld [vmem:[#allocation2 + $0x434] ss:$8 sps:$4 sm:$0xff]   ;;  %v1931_v63 = vld [vmem:[#allocation2 + $0x430] ss:$8 sps:$4 sm:$0xff]  }
 0x1a7   :  { %589 = vmatprep.mubr.bf16.mxu0 %v355_v0  ;;  %v1936_v0 = vld [vmem:[#allocation2 + $0x424] ss:$8 sps:$4 sm:$0xff]  }
 0x1a8   :  { %590 = vmatmul.mubr.bf16.vlgmr.msra.gmra.mxu0 %v354_v1  ;;  %v1934_v1 = vld [vmem:[#allocation2 + $0x420] ss:$8 sps:$4 sm:$0xff]  }
 0x1a9   :  { %1050 = vmatpush1.bf16.msra.mxu0 %v1871_v9  ;;  %v1945_v9 = vld [vmem:[#allocation2 + $0x4f4] ss:$8 sps:$4 sm:$0xff]  }
 0x1aa   :  { %1051 = vmatprep.subr.bf16.mxu0 %v1876_v11  ;;  %v1948_v11 = vld [vmem:[#allocation2 + $0x4e4] ss:$8 sps:$4 sm:$0xff]  }
 0x1ad   :  { %1052 = vmatpush1.bf16.msra.mxu0 %v1874_v12  ;;  %v1946_v12 = vld [vmem:[#allocation2 + $0x4e0] ss:$8 sps:$4 sm:$0xff]  }
 0x1ae   :  { %1053 = vmatprep.subr.bf16.mxu0 %v1879_v13  ;;  %v1951_v13 = vld [vmem:[#allocation2 + $0x4d4] ss:$8 sps:$4 sm:$0xff]  }
 0x1b1   :  { %1054 = vmatpush1.bf16.msra.mxu0 %v1877_v14  ;;  %v1949_v14 = vld [vmem:[#allocation2 + $0x4d0] ss:$8 sps:$4 sm:$0xff]  }
 0x1b2   :  { %1055 = vmatprep.subr.bf16.mxu0 %v1882_v15  ;;  %v1954_v15 = vld [vmem:[#allocation2 + $0x4c4] ss:$8 sps:$4 sm:$0xff]  }
 0x1b5   :  { %1056 = vmatpush1.bf16.msra.mxu0 %v1880_v16  ;;  %v1952_v16 = vld [vmem:[#allocation2 + $0x4c0] ss:$8 sps:$4 sm:$0xff]  }
 0x1b6   :  { %1057 = vmatprep.subr.bf16.mxu0 %v1885_v17  ;;  %v1957_v17 = vld [vmem:[#allocation2 + $0x4b4] ss:$8 sps:$4 sm:$0xff]  }
 0x1b9   :  { %1058 = vmatpush1.bf16.msra.mxu0 %v1883_v18  ;;  %v1955_v18 = vld [vmem:[#allocation2 + $0x4b0] ss:$8 sps:$4 sm:$0xff]  }
 0x1ba   :  { %1059 = vmatprep.subr.bf16.mxu0 %v1888_v19  ;;  %v1960_v19 = vld [vmem:[#allocation2 + $0x4a4] ss:$8 sps:$4 sm:$0xff]  }
 0x1bd   :  { %1060 = vmatpush1.bf16.msra.mxu0 %v1886_v20  ;;  %v1958_v20 = vld [vmem:[#allocation2 + $0x4a0] ss:$8 sps:$4 sm:$0xff]  }
 0x1be   :  { %1061 = vmatprep.subr.bf16.mxu0 %v1891_v21  ;;  %v637_v21 = vsub.s32 3, %v2048_v5 }
 0x1c1   :  { %1062 = vmatpush1.bf16.msra.mxu0 %v1889_v22  ;;  %v638_v22 = vrot.slane %v2054_v7, %v637_v21 }
 0x1c2   :  { %1063 = vmatprep.subr.bf16.mxu0 %v1894_v23  ;;  %v642_v23 = vrot.slane %v2059_v8, %v637_v21 }
 0x1c5   :  { %1064 = vmatpush1.bf16.msra.mxu0 %v1892_v24 }
 0x1c6   :  { %1065 = vmatprep.subr.bf16.mxu0 %v1897_v25 }
 0x1c9   :  { %1066 = vmatpush2.bf16.msra.mxu0 %v1895_v26 }
 0x1ca   :  { %1067 = vmatprep.subr.bf16.mxu0 %v1900_v27 }
 0x1cd   :  { %1068 = vmatpush2.bf16.msra.mxu0 %v1898_v28 }
 0x1ce   :  { %1069 = vmatprep.subr.bf16.mxu0 %v1903_v29 }
 0x1d1   :  { %1070 = vmatpush2.bf16.msra.mxu0 %v1901_v30 }
 0x1d2   :  { %1071 = vmatprep.subr.bf16.mxu0 %v1906_v31 }
 0x1d5   :  { %1072 = vmatpush2.bf16.msra.mxu0 %v1904_v32 }
 0x1d6   :  { %1073 = vmatprep.subr.bf16.mxu0 %v1909_v33 }
 0x1d9   :  { %1074 = vmatpush2.bf16.msra.mxu0 %v1907_v34  ;;  %v1963_v34 = vld [vmem:[#allocation2 + $0x494] ss:$8 sps:$4 sm:$0xff]  }
 0x1da   :  { %1075 = vmatprep.subr.bf16.mxu0 %v1912_v35  ;;  %v1961_v35 = vld [vmem:[#allocation2 + $0x490] ss:$8 sps:$4 sm:$0xff]  }
 0x1dd   :  { %1076 = vmatpush2.bf16.msra.mxu0 %v1910_v36  ;;  %v1966_v36 = vld [vmem:[#allocation2 + $0x484] ss:$8 sps:$4 sm:$0xff]  }
 0x1de   :  { %1077 = vmatprep.subr.bf16.mxu0 %v1915_v50  ;;  %v883_v50 = vsub.s32 4, %v2048_v5 }
 0x1e1   :  { %1078 = vmatpush2.bf16.msra.mxu0 %v1913_v51  ;;  %v884_v51 = vrot.slane %v2054_v7, %v883_v50 }
 0x1e2   :  { %1079 = vmatprep.subr.bf16.mxu0 %v1918_v52  ;;  %v888_v52 = vrot.slane %v2059_v8, %v883_v50 }
 0x1e5   :  { %1080 = vmatpush2.bf16.msra.mxu0 %v1916_v53 }
 0x268   :  { %v591_v40 = vpop.f32.mrf.mxu0 }
 0x269   :  { %v592_v41 = vadd.f32 %v591_v40, %v392_v38  ;;  %v1967_v38 = vld [vmem:[%s2135_s4 + $0x78] sm:$0xff]   ;;  %v1969_v40 = vld [vmem:[%s2135_s4 + $0x70] sm:$0xff]  }
 0x26a   :  { %v593_v42 = vpop.f32.mrf.mxu0  ;;  %1699 = vmatprep.subr.bf16.mxu0 %v1967_v38 }
 0x26b   :  { %v594_v43 = vadd.f32 %v593_v42, %v396_v39  ;;  %v598_v44 = vmax.f32 %v592_v41, 0.0  ;;  %v1968_v39 = vld [vmem:[%s2135_s4 + $0x38] sm:$0xff]   ;;  %v1970_v41 = vld [vmem:[%s2135_s4 + $0x30] sm:$0xff]   ;;  %v1971_v42 = vld [vmem:[%s2135_s4 + $0x68] sm:$0xff]  }
 0x26c   :  { %v595_v45 = vpop.f32.mrf.mxu0 }
 0x26d   :  { %v599_v46 = vmax.f32 %v594_v43, 0.0  ;;  %v600_v49 = vpack.c.bf16 %v598_v44, %v598_v44  ;;  %v1972_v43 = vld [vmem:[%s2135_s4 + $0x28] sm:$0xff]   ;;  %v1973_v44 = vld [vmem:[%s2135_s4 + $0x60] sm:$0xff]  }
 0x26e   :  { %v596_v47 = vpop.f32.mrf.mxu0  ;;  %v1974_v45 = vld [vmem:[%s2135_s4 + $0x20] sm:$0xff]  }
 0x26f   :  { %v601_v48 = vpack.c.bf16 %v599_v46, %v599_v46  ;;  %v1975_v46 = vld [vmem:[%s2135_s4 + $0x58] sm:$0xff]  }
 0x270   :  { %v1976_v47 = vld [vmem:[%s2135_s4 + $0x18] sm:$0xff]  }
 0x271   :  { %835 = vmatprep.mubr.bf16.mxu1 %v601_v48  ;;  %v1977_v48 = vld [vmem:[%s2135_s4 + $0x50] sm:$0xff]  }
 0x272   :  { %836 = vmatmul.mubr.bf16.vlgmr.msra.gmra.mxu1 %v600_v49  ;;  %v1978_v49 = vld [vmem:[%s2135_s4 + $0x10] sm:$0xff]  }
 0x273   :  { %1296 = vmatpush1.bf16.msra.mxu1 %v1919_v54 }
 0x274   :  { %1297 = vmatprep.subr.bf16.mxu1 %v1924_v56 }
 0x277   :  { %1298 = vmatpush1.bf16.msra.mxu1 %v1922_v57 }
 0x278   :  { %1299 = vmatprep.subr.bf16.mxu1 %v1927_v58 }
 0x27b   :  { %1300 = vmatpush1.bf16.msra.mxu1 %v1925_v59 }
 0x27c   :  { %1301 = vmatprep.subr.bf16.mxu1 %v1930_v60 }
 0x27f   :  { %1302 = vmatpush1.bf16.msra.mxu1 %v1928_v61 }
 0x280   :  { %1303 = vmatprep.subr.bf16.mxu1 %v1933_v62 }
 0x283   :  { %1304 = vmatpush1.bf16.msra.mxu1 %v1931_v63  ;;  %v1979_v63 = vld [vmem:[%s2135_s4 + $0x48] sm:$0xff]  }
 0x284   :  { %1305 = vmatprep.subr.bf16.mxu1 %v1936_v0  ;;  %v1980_v0 = vld [vmem:[%s2135_s4 + $0x8] sm:$0xff]  }
 0x287   :  { %1306 = vmatpush1.bf16.msra.mxu1 %v1934_v1  ;;  %v1981_v1 = vld [vmem:[%s2135_s4 + $0x40] sm:$0xff]  }
 0x288   :  { %1307 = vmatprep.subr.bf16.mxu1 %v1939_v2  ;;  %v1982_v2 = vld [vmem:[%s2135_s4] sm:$0xff]  }
 0x28b   :  { %1308 = vmatpush1.bf16.msra.mxu1 %v1937_v3  ;;  %v1129_v3 = vsub.s32 5, %v2048_v5 }
 0x28c   :  { %1309 = vmatprep.subr.bf16.mxu1 %v1942_v4 }
 0x28d   :  { %v1130_v4 = vrot.slane %v2054_v7, %v1129_v3 }
 0x28f   :  { %1310 = vmatpush1.bf16.msra.mxu1 %v1940_v6  ;;  %v1134_v6 = vrot.slane %v2059_v8, %v1129_v3 }
 0x290   :  { %1311 = vmatprep.subr.bf16.mxu1 %v1945_v9 }
 0x293   :  { %1312 = vmatpush2.bf16.msra.mxu1 %v1943_v10 }
 0x294   :  { %1313 = vmatprep.subr.bf16.mxu1 %v1948_v11 }
 0x297   :  { %1314 = vmatpush2.bf16.msra.mxu1 %v1946_v12 }
 0x298   :  { %1315 = vmatprep.subr.bf16.mxu1 %v1951_v13 }
 0x29b   :  { %1316 = vmatpush2.bf16.msra.mxu1 %v1949_v14 }
 0x29c   :  { %1317 = vmatprep.subr.bf16.mxu1 %v1954_v15 }
 0x29f   :  { %1318 = vmatpush2.bf16.msra.mxu1 %v1952_v16 }
 0x2a0   :  { %1319 = vmatprep.subr.bf16.mxu1 %v1957_v17 }
 0x2a3   :  { %1320 = vmatpush2.bf16.msra.mxu1 %v1955_v18 }
 0x2a4   :  { %1321 = vmatprep.subr.bf16.mxu1 %v1960_v19  ;;  %v1374_v19 = vsub.s32 6, %v2048_v5 }
 0x2a6   :  { %v1375_v21 = vrot.slane %v2054_v7, %v1374_v19 }
 0x2a7   :  { %1322 = vmatpush2.bf16.msra.mxu1 %v1958_v20 }
 0x2a8   :  { %1323 = vmatprep.subr.bf16.mxu1 %v1963_v34 }
 0x2ab   :  { %1324 = vmatpush2.bf16.msra.mxu1 %v1961_v35 }
 0x2ac   :  { %1325 = vmatprep.subr.bf16.mxu1 %v1966_v36 }
 0x2af   :  { %1326 = vmatpush2.bf16.msra.mxu1 %v1964_v37 }
 0x332   :  { %v837_v24 = vpop.f32.mrf.mxu1 }
 0x333   :  { %v838_v25 = vadd.f32 %v837_v24, %v638_v22 }
 0x334   :  { %v839_v26 = vpop.f32.mrf.mxu1 }
 0x335   :  { %v840_v27 = vadd.f32 %v839_v26, %v642_v23  ;;  %v844_v28 = vmax.f32 %v838_v25, 0.0 }
 0x336   :  { %v841_v29 = vpop.f32.mrf.mxu1 }
 0x337   :  { %v845_v30 = vmax.f32 %v840_v27, 0.0  ;;  %v846_v33 = vpack.c.bf16 %v844_v28, %v844_v28 }
 0x338   :  { %v842_v31 = vpop.f32.mrf.mxu1 }
 0x339   :  { %v847_v32 = vpack.c.bf16 %v845_v30, %v845_v30 }
 0x33b   :  { %1081 = vmatprep.mubr.bf16.mxu0 %v847_v32 }
 0x33c   :  { %1082 = vmatmul.mubr.bf16.vlgmr.msra.gmra.mxu0 %v846_v33 }
 0x33d   :  { %1700 = vmatpush3.bf16.msra.mxu0 %v1968_v39 }
 0x33e   :  { %1701 = vmatprep.subr.bf16.mxu0 %v1969_v40 }
 0x341   :  { %1702 = vmatpush3.bf16.msra.mxu0 %v1970_v41 }
 0x342   :  { %1703 = vmatprep.subr.bf16.mxu0 %v1971_v42 }
 0x345   :  { %1704 = vmatpush3.bf16.msra.mxu0 %v1972_v43 }
 0x346   :  { %1705 = vmatprep.subr.bf16.mxu0 %v1973_v44 }
 0x349   :  { %1706 = vmatpush3.bf16.msra.mxu0 %v1974_v45 }
 0x34a   :  { %1707 = vmatprep.subr.bf16.mxu0 %v1975_v46 }
 0x34d   :  { %1708 = vmatpush3.bf16.msra.mxu0 %v1976_v47 }
 0x34e   :  { %1709 = vmatprep.subr.bf16.mxu0 %v1977_v48 }
 0x351   :  { %1710 = vmatpush3.bf16.msra.mxu0 %v1978_v49 }
 0x352   :  { %1711 = vmatprep.subr.bf16.mxu0 %v1979_v63 }
 0x355   :  { %1712 = vmatpush3.bf16.msra.mxu0 %v1980_v0 }
 0x356   :  { %1713 = vmatprep.subr.bf16.mxu0 %v1981_v1 }
 0x359   :  { %1714 = vmatpush3.bf16.msra.mxu0 %v1982_v2 }
 0x3fc   :  { %v1083_v53 = vpop.f32.mrf.mxu0 }
 0x3fd   :  { %v1084_v54 = vadd.f32 %v1083_v53, %v884_v51 }
 0x3fe   :  { %v1085_v55 = vpop.f32.mrf.mxu0 }
 0x3ff   :  { %v1086_v56 = vadd.f32 %v1085_v55, %v888_v52  ;;  %v1090_v57 = vmax.f32 %v1084_v54, 0.0 }
 0x400   :  { %v1087_v58 = vpop.f32.mrf.mxu0 }
 0x401   :  { %v1091_v59 = vmax.f32 %v1086_v56, 0.0  ;;  %v1092_v62 = vpack.c.bf16 %v1090_v57, %v1090_v57 }
 0x402   :  { %v1088_v60 = vpop.f32.mrf.mxu0 }
 0x403   :  { %v1093_v61 = vpack.c.bf16 %v1091_v59, %v1091_v59 }
 0x405   :  { %1327 = vmatprep.mubr.bf16.mxu1 %v1093_v61 }
 0x406   :  { %1328 = vmatmul.mubr.bf16.vlgmr.msra.gmra.mxu1 %v1092_v62 }
 0x4c6   :  { %v1329_v9 = vpop.f32.mrf.mxu1 }
 0x4c7   :  { %v1330_v10 = vadd.f32 %v1329_v9, %v1130_v4 }
 0x4c8   :  { %v1331_v11 = vpop.f32.mrf.mxu1 }
 0x4c9   :  { %v1332_v12 = vadd.f32 %v1331_v11, %v1134_v6  ;;  %v1336_v13 = vmax.f32 %v1330_v10, 0.0 }
 0x4ca   :  { %v1333_v14 = vpop.f32.mrf.mxu1 }
 0x4cb   :  { %v1337_v15 = vmax.f32 %v1332_v12, 0.0  ;;  %v1338_v18 = vpack.c.bf16 %v1336_v13, %v1336_v13 }
 0x4cc   :  { %v1334_v16 = vpop.f32.mrf.mxu1 }
 0x4cd   :  { %v1339_v17 = vpack.c.bf16 %v1337_v15, %v1337_v15 }
 0x4cf   :  { %1504 = vmatprep.mubr.bf16.mxu0 %v1339_v17 }
 0x4d0   :  { %1505 = vmatmul.mubr.bf16.vlgmr.msra.gmra.mxu0 %v1338_v18 }
 0x590   :  { %v1715_v20 = vpop.f32.mrf.mxu0 }
 0x592   :  { %v1716_v22 = vpop.f32.mrf.mxu0 }
 0x593   :  { %v1717_v23 = vadd.f32 %v1716_v22, %v1715_v20 }
 0x594   :  { %v1718_v8 = vpop.f32.mrf.mxu0 }
 0x595   :  { %v1507_v24 = vadd.f32 %v1717_v23, %v1375_v21 }
 0x596   :  { %v1719_v25 = vpop.f32.mrf.mxu0 }
 0x597   :  { %1513 = vst.msk [vmem:[%s2136_s5] sm:$0xff] %vm1512_vm3, %v1507_v24 }
 0x598   :  { %1518 = vsyncpa [#allocation3], 1 }

</bundles_post_ra>
